<compile_context>
chip_gen: v5e
topology: v5e:2x2
jax: 0.10.0
libtpu: 0.0.40
codegen_flags: <defaults>
</compile_context>

<pallas_src>
import functools

import jax
import jax.numpy as jnp
from jax.experimental import pallas as pl
from jax.experimental.pallas import tpu as pltpu


def _round_up(x, m):
    return (x + m - 1) // m * m


def _vmem_limit_bytes():
    cap = 128 * 1024 * 1024
    try:
        info = pltpu.get_tpu_info()
        cap = int(getattr(info, "vmem_capacity_bytes", cap) or cap)
    except Exception:
        pass
    return min(cap * 3 // 4, 100 * 1024 * 1024)


# -----------------------------------------------------------------------------
# Pallas kernel: fused  out = [relu]( conv_kxk(x)*scale + bias [+ shortcut] )
# One grid step = one image.  The conv is computed as k*k shifted-slice taps,
# each a [Ho*Wc, Cin] @ [Cin, Cout] MXU dot accumulated in f32.
#   modes: "plain"    -> no residual
#          "identity" -> bf16 residual tensor added before ReLU
#          "proj"     -> fused 1x1 shortcut conv + bn added before ReLU
# -----------------------------------------------------------------------------
def _tap_conv_kernel(*refs, nphase, ksize, stride, Ho, Wo, Wc, relu, mode):
    idx = 0
    phase_refs = refs[idx:idx + nphase]; idx += nphase
    w_ref = refs[idx]; idx += 1          # (k*k, Cin, Cout) bf16
    s_ref = refs[idx]; idx += 1          # (1, Cout) f32   (folded BN scale)
    b_ref = refs[idx]; idx += 1          # (1, Cout) f32   (folded BN bias)
    if mode == "proj":
        sp_ref = refs[idx]; sw_ref = refs[idx + 1]
        ss_ref = refs[idx + 2]; sb_ref = refs[idx + 3]
        idx += 4
    elif mode == "identity":
        r_ref = refs[idx]; idx += 1
    o_ref = refs[idx]

    cout = o_ref.shape[-1]
    acc = jnp.zeros((Ho * Wc, cout), jnp.float32)
    for kh in range(ksize):
        for kw in range(ksize):
            ph, pw = kh % stride, kw % stride
            oh, ow = kh // stride, kw // stride
            # Contiguous (static) slice of the VMEM-resident phase slab.
            tap = phase_refs[ph * stride + pw][0, oh:oh + Ho, ow:ow + Wc, :]
            lhs = tap.reshape(Ho * Wc, tap.shape[-1])
            acc = acc + jnp.dot(lhs, w_ref[kh * ksize + kw],
                                preferred_element_type=jnp.float32)

    y = acc * s_ref[...] + b_ref[...]
    if mode == "proj":
        sx = sp_ref[0]                                    # (Ho, Wc, Cs)
        sc = jnp.dot(sx.reshape(Ho * Wc, sx.shape[-1]), sw_ref[...],
                     preferred_element_type=jnp.float32)
        y = y + sc * ss_ref[...] + sb_ref[...]
    elif mode == "identity":
        y = y + r_ref[0].reshape(Ho * Wc, cout).astype(jnp.float32)
    if relu:
        y = jnp.maximum(y, 0.0)

    y = y.reshape(Ho, Wc, cout)
    if Wc != Wo:
        y = y[:, :Wo, :]
    o_ref[0] = y.astype(o_ref.dtype)


def tap_conv_bn(x_nhwc, w_oihw, scale, bias, *, stride, padding, relu,
                shortcut=None, residual=None, out_dtype=jnp.bfloat16):
    """Fused conv(kxk, stride, pad, no bias) + folded-BN [+ shortcut] [+ ReLU].

    x_nhwc   : [N, H, W, Cin]
    w_oihw   : [Cout, Cin, k, k]  (PyTorch layout)
    shortcut : optional (xs [N,Ho,Wo,Cs], ws [Cs,Cout], ss [Cout], sb [Cout])
    residual : optional [N, Ho, Wo, Cout]
    """
    N, H, W, Cin = x_nhwc.shape
    Cout, Cin_w, k, k2 = w_oihw.shape
    assert Cin == Cin_w and k == k2

    Ho = (H + 2 * padding - k) // stride + 1
    Wo = (W + 2 * padding - k) // stride + 1
    Wc = _round_up(Wo, 8)            # sublane-aligned compute width

    # Cast once to bf16, then halo-pad spatially (no 9x patch matrix).
    xb = x_nhwc.astype(jnp.bfloat16)
    xp = jnp.pad(xb, ((0, 0), (padding, padding), (padding, padding), (0, 0)))

    # Phase decomposition: tap (kh, kw) of a stride-s conv reads phase
    # (kh % s, kw % s) at contiguous offset (kh // s, kw // s).
    halo = (k - 1) // stride
    Hi, Wi = Ho + halo, Wc + halo
    phases = []
    for ph in range(stride):
        for pw in range(stride):
            p = xp[:, ph::stride, pw::stride, :]
            p = p[:, :Hi, :Wi, :]
            dh, dw = Hi - p.shape[1], Wi - p.shape[2]
            if dh or dw:
                p = jnp.pad(p, ((0, 0), (0, dh), (0, dw), (0, 0)))
            phases.append(p)

    w3 = jnp.transpose(w_oihw, (2, 3, 1, 0)).reshape(k * k, Cin, Cout)
    w3 = w3.astype(jnp.bfloat16)
    s2 = scale.reshape(1, Cout).astype(jnp.float32)
    b2 = bias.reshape(1, Cout).astype(jnp.float32)

    in_specs = [pl.BlockSpec((1, Hi, Wi, Cin), lambda n: (n, 0, 0, 0))
                for _ in phases]
    in_specs += [
        pl.BlockSpec((k * k, Cin, Cout), lambda n: (0, 0, 0)),
        pl.BlockSpec((1, Cout), lambda n: (0, 0)),
        pl.BlockSpec((1, Cout), lambda n: (0, 0)),
    ]
    args = list(phases) + [w3, s2, b2]
    flops = 2 * N * Ho * Wc * (k * k * Cin) * Cout

    if shortcut is not None:
        xs, ws, ss, sb = shortcut
        assert xs.shape[:3] == (N, Ho, Wo)
        Cs = xs.shape[-1]
        xsb = xs.astype(jnp.bfloat16)
        if Wc != Wo:
            xsb = jnp.pad(xsb, ((0, 0), (0, 0), (0, Wc - Wo), (0, 0)))
        args += [xsb, ws.astype(jnp.bfloat16),
                 ss.reshape(1, Cout).astype(jnp.float32),
                 sb.reshape(1, Cout).astype(jnp.float32)]
        in_specs += [
            pl.BlockSpec((1, Ho, Wc, Cs), lambda n: (n, 0, 0, 0)),
            pl.BlockSpec((Cs, Cout), lambda n: (0, 0)),
            pl.BlockSpec((1, Cout), lambda n: (0, 0)),
            pl.BlockSpec((1, Cout), lambda n: (0, 0)),
        ]
        mode = "proj"
        flops += 2 * N * Ho * Wc * Cs * Cout
    elif residual is not None:
        assert residual.shape == (N, Ho, Wo, Cout)
        rb = residual.astype(jnp.bfloat16)    # bf16 residual: half the read bytes
        if Wc != Wo:
            rb = jnp.pad(rb, ((0, 0), (0, 0), (0, Wc - Wo), (0, 0)))
        args.append(rb)
        in_specs.append(pl.BlockSpec((1, Ho, Wc, Cout), lambda n: (n, 0, 0, 0)))
        mode = "identity"
    else:
        mode = "plain"

    out_shape = jax.ShapeDtypeStruct((N, Ho, Wo, Cout), out_dtype)
    bytes_accessed = sum(int(a.size) * a.dtype.itemsize for a in args)
    bytes_accessed += N * Ho * Wo * Cout * jnp.dtype(out_dtype).itemsize

    kernel = functools.partial(
        _tap_conv_kernel, nphase=stride * stride, ksize=k, stride=stride,
        Ho=Ho, Wo=Wo, Wc=Wc, relu=relu, mode=mode)

    return pl.pallas_call(
        kernel,
        out_shape=out_shape,
        grid_spec=pltpu.PrefetchScalarGridSpec(
            num_scalar_prefetch=0,
            grid=(N,),
            in_specs=in_specs,
            out_specs=pl.BlockSpec((1, Ho, Wo, Cout), lambda n: (n, 0, 0, 0)),
        ),
        compiler_params=pltpu.CompilerParams(
            dimension_semantics=("parallel",),
            vmem_limit_bytes=_vmem_limit_bytes(),
        ),
        cost_estimate=pl.CostEstimate(
            flops=flops, transcendentals=0, bytes_accessed=bytes_accessed),
    )(*args)


# -----------------------------------------------------------------------------
# Glue: BN folding / weight reshaping (plain JAX; fuses into surrounding XLA)
# -----------------------------------------------------------------------------
def bn_affine(gamma, beta, mean, var, eps=1e-5):
    scale = gamma / jnp.sqrt(var + eps)
    return scale, beta - mean * scale


def conv1x1_weight_to_matrix(w_oihw):
    cout, cin = w_oihw.shape[:2]
    return jnp.transpose(w_oihw, (2, 3, 1, 0)).reshape(cin, cout)


# -----------------------------------------------------------------------------
# BasicBlock forward
# -----------------------------------------------------------------------------
def basic_block_forward(x_nchw, params, stride):
    x = jnp.transpose(x_nchw, (0, 2, 3, 1))            # NHWC
    planes, in_planes = params["w1"].shape[0], params["w1"].shape[1]

    # conv1 (3x3, stride, pad=1) + bn1 + relu  -> bf16 intermediate
    s1, b1 = bn_affine(*params["bn1"])
    y1 = tap_conv_bn(x, params["w1"], s1, b1, stride=stride, padding=1,
                     relu=True, out_dtype=jnp.bfloat16)
    N, Ho, Wo, _ = y1.shape

    # conv2 (3x3, 1, pad=1) + bn2 + shortcut + relu, all in one fused kernel
    s2, b2 = bn_affine(*params["bn2"])
    if stride != 1 or in_planes != planes:
        # projection shortcut: 1x1 conv (stride) + bn, fused into conv2 kernel
        ss, bs = bn_affine(*params["bns"])
        xs = x[:, ::stride, ::stride, :][:, :Ho, :Wo, :]
        ws = conv1x1_weight_to_matrix(params["ws"])
        y2 = tap_conv_bn(y1, params["w2"], s2, b2, stride=1, padding=1,
                         relu=True, out_dtype=jnp.float32,
                         shortcut=(xs, ws, ss, bs))
    else:
        y2 = tap_conv_bn(y1, params["w2"], s2, b2, stride=1, padding=1,
                         relu=True, out_dtype=jnp.float32, residual=x)

    return jnp.transpose(y2, (0, 3, 1, 2))             # back to NCHW


# -----------------------------------------------------------------------------
# Pure-JAX reference (lax.conv) for correctness check
# -----------------------------------------------------------------------------
def ref_forward(x, params, stride):
    def conv(x, w, s, pad):
        return jax.lax.conv_general_dilated(
            x, w, window_strides=(s, s), padding=[(pad, pad), (pad, pad)],
            dimension_numbers=("NCHW", "OIHW", "NCHW"))

    def bn(x, p):
        g, b, m, v = p
        s = g / jnp.sqrt(v + 1e-5)
        return x * s[None, :, None, None] + (b - m * s)[None, :, None, None]

    out = jax.nn.relu(bn(conv(x, params["w1"], stride, 1), params["bn1"]))
    out = bn(conv(out, params["w2"], 1, 1), params["bn2"])
    if "ws" in params:
        sc = bn(conv(x, params["ws"], stride, 0), params["bns"])
    else:
        sc = x
    return jax.nn.relu(out + sc)


# -----------------------------------------------------------------------------
# Deterministic parameter construction + run
# -----------------------------------------------------------------------------
def make_params(key, in_planes, planes, stride):
    ks = jax.random.split(key, 12)

    def bn_params(k, c):
        k1, k2, k3, k4 = jax.random.split(k, 4)
        gamma = 1.0 + 0.1 * jax.random.normal(k1, (c,), jnp.float32)
        beta = 0.1 * jax.random.normal(k2, (c,), jnp.float32)
        mean = 0.1 * jax.random.normal(k3, (c,), jnp.float32)
        var = 0.5 + jnp.abs(jax.random.normal(k4, (c,), jnp.float32))
        return (gamma, beta, mean, var)

    params = {
        "w1": 0.1 * jax.random.normal(ks[0], (planes, in_planes, 3, 3), jnp.float32),
        "bn1": bn_params(ks[1], planes),
        "w2": 0.1 * jax.random.normal(ks[2], (planes, planes, 3, 3), jnp.float32),
        "bn2": bn_params(ks[3], planes),
    }
    if stride != 1 or in_planes != planes:
        params["ws"] = 0.1 * jax.random.normal(
            ks[4], (planes, in_planes, 1, 1), jnp.float32)
        params["bns"] = bn_params(ks[5], planes)
    return params


def _check(x, params, stride, expected_shape):
    fwd = jax.jit(basic_block_forward, static_argnums=2)
    ref_fn = jax.jit(ref_forward, static_argnums=2)
    out = jax.block_until_ready(fwd(x, params, stride))
    ref = jax.block_until_ready(ref_fn(x, params, stride))
    assert out.shape == ref.shape == expected_shape, (out.shape, ref.shape)
    # bf16 activations feed the MXU -> slightly relaxed tolerance vs f32 ref.
    err = float(jnp.max(jnp.abs(out - ref)))
    assert jnp.allclose(out, ref, rtol=5e-2, atol=5e-2), err


if __name__ == "__main__":
    key = jax.random.PRNGKey(0)
    kx1, kp1, kx2, kp2 = jax.random.split(key, 4)

    # Case 1: projection shortcut (stride=2, channel change), batch=2, 16x16.
    N, in_planes, planes, stride, H = 2, 4, 8, 2, 16
    x1 = jax.random.normal(kx1, (N, in_planes, H, H), jnp.float32)  # NCHW
    params1 = make_params(kp1, in_planes, planes, stride)
    _check(x1, params1, stride, (N, planes, H // stride, H // stride))

    # Case 2: identity shortcut (stride=1, same channels).
    x2 = jax.random.normal(kx2, (N, planes, H, H), jnp.float32)
    params2 = make_params(kp2, planes, planes, 1)
    _check(x2, params2, 1, (N, planes, H, H))

    print("KERNEL_OK")
</pallas_src>

<mosaic_0001>
module attributes {stable_mosaic.version = 11 : i64} {
  func.func @_tap_conv_kernel(%arg0: i32, %arg1: memref<1x9x9x4xbf16, #tpu.memory_space<vmem>>, %arg2: memref<1x9x9x4xbf16, #tpu.memory_space<vmem>>, %arg3: memref<1x9x9x4xbf16, #tpu.memory_space<vmem>>, %arg4: memref<1x9x9x4xbf16, #tpu.memory_space<vmem>>, %arg5: memref<9x4x8xbf16, #tpu.memory_space<vmem>>, %arg6: memref<1x8xf32, #tpu.memory_space<vmem>>, %arg7: memref<1x8xf32, #tpu.memory_space<vmem>>, %arg8: memref<1x8x8x8xbf16, #tpu.memory_space<vmem>>) attributes {dimension_semantics = [#tpu.dimension_semantics<parallel>], iteration_bounds = array<i64: 2>, scalar_prefetch = 0 : i64, scratch_operands = 0 : i64, tpu.core_type = #tpu.core_type<tc>, window_params = [{transform_indices = @transform_0, window_bounds = array<i64: 1, 9, 9, 4>}, {transform_indices = @transform_1, window_bounds = array<i64: 1, 9, 9, 4>}, {transform_indices = @transform_2, window_bounds = array<i64: 1, 9, 9, 4>}, {transform_indices = @transform_3, window_bounds = array<i64: 1, 9, 9, 4>}, {pipeline_mode = #tpu.pipeline_mode<synchronous>, transform_indices = @transform_4, window_bounds = array<i64: 9, 4, 8>}, {pipeline_mode = #tpu.pipeline_mode<synchronous>, transform_indices = @transform_5, window_bounds = array<i64: 1, 8>}, {pipeline_mode = #tpu.pipeline_mode<synchronous>, transform_indices = @transform_6, window_bounds = array<i64: 1, 8>}, {transform_indices = @transform_7, window_bounds = array<i64: 1, 8, 8, 8>}]} {
    %cst = arith.constant 0.000000e+00 : f32
    %0 = vector.broadcast %cst : f32 to vector<64x8xf32>
    %c0 = arith.constant 0 : index
    %c0_0 = arith.constant 0 : index
    %c0_1 = arith.constant 0 : index
    %c0_2 = arith.constant 0 : index
    %1 = vector.load %arg1[%c0, %c0_0, %c0_1, %c0_2] : memref<1x9x9x4xbf16, #tpu.memory_space<vmem>>, vector<1x8x8x4xbf16>
    %2 = vector.shape_cast %1 : vector<1x8x8x4xbf16> to vector<8x8x4xbf16>
    %3 = vector.shape_cast %2 : vector<8x8x4xbf16> to vector<64x4xbf16>
    %c0_3 = arith.constant 0 : index
    %c0_4 = arith.constant 0 : index
    %c0_5 = arith.constant 0 : index
    %4 = vector.load %arg5[%c0_3, %c0_4, %c0_5] : memref<9x4x8xbf16, #tpu.memory_space<vmem>>, vector<1x4x8xbf16>
    %5 = vector.shape_cast %4 : vector<1x4x8xbf16> to vector<4x8xbf16>
    %cst_6 = arith.constant dense<0.000000e+00> : vector<64x8xf32>
    %6 = tpu.matmul %3, %5, %cst_6 {dimension_numbers = #tpu.dot_dimension_numbers<[1], [0], [0], [1], [0, 0, 1, 1], [], []>} : vector<64x4xbf16>, vector<4x8xbf16>, vector<64x8xf32> -> vector<64x8xf32>
    %7 = arith.addf %0, %6 : vector<64x8xf32>
    %c0_7 = arith.constant 0 : index
    %c0_8 = arith.constant 0 : index
    %c0_9 = arith.constant 0 : index
    %c0_10 = arith.constant 0 : index
    %8 = vector.load %arg2[%c0_7, %c0_8, %c0_9, %c0_10] : memref<1x9x9x4xbf16, #tpu.memory_space<vmem>>, vector<1x8x8x4xbf16>
    %9 = vector.shape_cast %8 : vector<1x8x8x4xbf16> to vector<8x8x4xbf16>
    %10 = vector.shape_cast %9 : vector<8x8x4xbf16> to vector<64x4xbf16>
    %c1 = arith.constant 1 : index
    %c0_11 = arith.constant 0 : index
    %c0_12 = arith.constant 0 : index
    %11 = vector.load %arg5[%c1, %c0_11, %c0_12] : memref<9x4x8xbf16, #tpu.memory_space<vmem>>, vector<1x4x8xbf16>
    %12 = vector.shape_cast %11 : vector<1x4x8xbf16> to vector<4x8xbf16>
    %cst_13 = arith.constant dense<0.000000e+00> : vector<64x8xf32>
    %13 = tpu.matmul %10, %12, %cst_13 {dimension_numbers = #tpu.dot_dimension_numbers<[1], [0], [0], [1], [0, 0, 1, 1], [], []>} : vector<64x4xbf16>, vector<4x8xbf16>, vector<64x8xf32> -> vector<64x8xf32>
    %14 = arith.addf %7, %13 : vector<64x8xf32>
    %c0_14 = arith.constant 0 : index
    %c0_15 = arith.constant 0 : index
    %c1_16 = arith.constant 1 : index
    %c0_17 = arith.constant 0 : index
    %15 = vector.load %arg1[%c0_14, %c0_15, %c1_16, %c0_17] : memref<1x9x9x4xbf16, #tpu.memory_space<vmem>>, vector<1x8x8x4xbf16>
    %16 = vector.shape_cast %15 : vector<1x8x8x4xbf16> to vector<8x8x4xbf16>
    %17 = vector.shape_cast %16 : vector<8x8x4xbf16> to vector<64x4xbf16>
    %c2 = arith.constant 2 : index
    %c0_18 = arith.constant 0 : index
    %c0_19 = arith.constant 0 : index
    %18 = vector.load %arg5[%c2, %c0_18, %c0_19] : memref<9x4x8xbf16, #tpu.memory_space<vmem>>, vector<1x4x8xbf16>
    %19 = vector.shape_cast %18 : vector<1x4x8xbf16> to vector<4x8xbf16>
    %cst_20 = arith.constant dense<0.000000e+00> : vector<64x8xf32>
    %20 = tpu.matmul %17, %19, %cst_20 {dimension_numbers = #tpu.dot_dimension_numbers<[1], [0], [0], [1], [0, 0, 1, 1], [], []>} : vector<64x4xbf16>, vector<4x8xbf16>, vector<64x8xf32> -> vector<64x8xf32>
    %21 = arith.addf %14, %20 : vector<64x8xf32>
    %c0_21 = arith.constant 0 : index
    %c0_22 = arith.constant 0 : index
    %c0_23 = arith.constant 0 : index
    %c0_24 = arith.constant 0 : index
    %22 = vector.load %arg3[%c0_21, %c0_22, %c0_23, %c0_24] : memref<1x9x9x4xbf16, #tpu.memory_space<vmem>>, vector<1x8x8x4xbf16>
    %23 = vector.shape_cast %22 : vector<1x8x8x4xbf16> to vector<8x8x4xbf16>
    %24 = vector.shape_cast %23 : vector<8x8x4xbf16> to vector<64x4xbf16>
    %c3 = arith.constant 3 : index
    %c0_25 = arith.constant 0 : index
    %c0_26 = arith.constant 0 : index
    %25 = vector.load %arg5[%c3, %c0_25, %c0_26] : memref<9x4x8xbf16, #tpu.memory_space<vmem>>, vector<1x4x8xbf16>
    %26 = vector.shape_cast %25 : vector<1x4x8xbf16> to vector<4x8xbf16>
    %cst_27 = arith.constant dense<0.000000e+00> : vector<64x8xf32>
    %27 = tpu.matmul %24, %26, %cst_27 {dimension_numbers = #tpu.dot_dimension_numbers<[1], [0], [0], [1], [0, 0, 1, 1], [], []>} : vector<64x4xbf16>, vector<4x8xbf16>, vector<64x8xf32> -> vector<64x8xf32>
    %28 = arith.addf %21, %27 : vector<64x8xf32>
    %c0_28 = arith.constant 0 : index
    %c0_29 = arith.constant 0 : index
    %c0_30 = arith.constant 0 : index
    %c0_31 = arith.constant 0 : index
    %29 = vector.load %arg4[%c0_28, %c0_29, %c0_30, %c0_31] : memref<1x9x9x4xbf16, #tpu.memory_space<vmem>>, vector<1x8x8x4xbf16>
    %30 = vector.shape_cast %29 : vector<1x8x8x4xbf16> to vector<8x8x4xbf16>
    %31 = vector.shape_cast %30 : vector<8x8x4xbf16> to vector<64x4xbf16>
    %c4 = arith.constant 4 : index
    %c0_32 = arith.constant 0 : index
    %c0_33 = arith.constant 0 : index
    %32 = vector.load %arg5[%c4, %c0_32, %c0_33] : memref<9x4x8xbf16, #tpu.memory_space<vmem>>, vector<1x4x8xbf16>
    %33 = vector.shape_cast %32 : vector<1x4x8xbf16> to vector<4x8xbf16>
    %cst_34 = arith.constant dense<0.000000e+00> : vector<64x8xf32>
    %34 = tpu.matmul %31, %33, %cst_34 {dimension_numbers = #tpu.dot_dimension_numbers<[1], [0], [0], [1], [0, 0, 1, 1], [], []>} : vector<64x4xbf16>, vector<4x8xbf16>, vector<64x8xf32> -> vector<64x8xf32>
    %35 = arith.addf %28, %34 : vector<64x8xf32>
    %c0_35 = arith.constant 0 : index
    %c0_36 = arith.constant 0 : index
    %c1_37 = arith.constant 1 : index
    %c0_38 = arith.constant 0 : index
    %36 = vector.load %arg3[%c0_35, %c0_36, %c1_37, %c0_38] : memref<1x9x9x4xbf16, #tpu.memory_space<vmem>>, vector<1x8x8x4xbf16>
    %37 = vector.shape_cast %36 : vector<1x8x8x4xbf16> to vector<8x8x4xbf16>
    %38 = vector.shape_cast %37 : vector<8x8x4xbf16> to vector<64x4xbf16>
    %c5 = arith.constant 5 : index
    %c0_39 = arith.constant 0 : index
    %c0_40 = arith.constant 0 : index
    %39 = vector.load %arg5[%c5, %c0_39, %c0_40] : memref<9x4x8xbf16, #tpu.memory_space<vmem>>, vector<1x4x8xbf16>
    %40 = vector.shape_cast %39 : vector<1x4x8xbf16> to vector<4x8xbf16>
    %cst_41 = arith.constant dense<0.000000e+00> : vector<64x8xf32>
    %41 = tpu.matmul %38, %40, %cst_41 {dimension_numbers = #tpu.dot_dimension_numbers<[1], [0], [0], [1], [0, 0, 1, 1], [], []>} : vector<64x4xbf16>, vector<4x8xbf16>, vector<64x8xf32> -> vector<64x8xf32>
    %42 = arith.addf %35, %41 : vector<64x8xf32>
    %c0_42 = arith.constant 0 : index
    %c1_43 = arith.constant 1 : index
    %c0_44 = arith.constant 0 : index
    %c0_45 = arith.constant 0 : index
    %43 = vector.load %arg1[%c0_42, %c1_43, %c0_44, %c0_45] : memref<1x9x9x4xbf16, #tpu.memory_space<vmem>>, vector<1x8x8x4xbf16>
    %44 = vector.shape_cast %43 : vector<1x8x8x4xbf16> to vector<8x8x4xbf16>
    %45 = vector.shape_cast %44 : vector<8x8x4xbf16> to vector<64x4xbf16>
    %c6 = arith.constant 6 : index
    %c0_46 = arith.constant 0 : index
    %c0_47 = arith.constant 0 : index
    %46 = vector.load %arg5[%c6, %c0_46, %c0_47] : memref<9x4x8xbf16, #tpu.memory_space<vmem>>, vector<1x4x8xbf16>
    %47 = vector.shape_cast %46 : vector<1x4x8xbf16> to vector<4x8xbf16>
    %cst_48 = arith.constant dense<0.000000e+00> : vector<64x8xf32>
    %48 = tpu.matmul %45, %47, %cst_48 {dimension_numbers = #tpu.dot_dimension_numbers<[1], [0], [0], [1], [0, 0, 1, 1], [], []>} : vector<64x4xbf16>, vector<4x8xbf16>, vector<64x8xf32> -> vector<64x8xf32>
    %49 = arith.addf %42, %48 : vector<64x8xf32>
    %c0_49 = arith.constant 0 : index
    %c1_50 = arith.constant 1 : index
    %c0_51 = arith.constant 0 : index
    %c0_52 = arith.constant 0 : index
    %50 = vector.load %arg2[%c0_49, %c1_50, %c0_51, %c0_52] : memref<1x9x9x4xbf16, #tpu.memory_space<vmem>>, vector<1x8x8x4xbf16>
    %51 = vector.shape_cast %50 : vector<1x8x8x4xbf16> to vector<8x8x4xbf16>
    %52 = vector.shape_cast %51 : vector<8x8x4xbf16> to vector<64x4xbf16>
    %c7 = arith.constant 7 : index
    %c0_53 = arith.constant 0 : index
    %c0_54 = arith.constant 0 : index
    %53 = vector.load %arg5[%c7, %c0_53, %c0_54] : memref<9x4x8xbf16, #tpu.memory_space<vmem>>, vector<1x4x8xbf16>
    %54 = vector.shape_cast %53 : vector<1x4x8xbf16> to vector<4x8xbf16>
    %cst_55 = arith.constant dense<0.000000e+00> : vector<64x8xf32>
    %55 = tpu.matmul %52, %54, %cst_55 {dimension_numbers = #tpu.dot_dimension_numbers<[1], [0], [0], [1], [0, 0, 1, 1], [], []>} : vector<64x4xbf16>, vector<4x8xbf16>, vector<64x8xf32> -> vector<64x8xf32>
    %56 = arith.addf %49, %55 : vector<64x8xf32>
    %c0_56 = arith.constant 0 : index
    %c1_57 = arith.constant 1 : index
    %c1_58 = arith.constant 1 : index
    %c0_59 = arith.constant 0 : index
    %57 = vector.load %arg1[%c0_56, %c1_57, %c1_58, %c0_59] : memref<1x9x9x4xbf16, #tpu.memory_space<vmem>>, vector<1x8x8x4xbf16>
    %58 = vector.shape_cast %57 : vector<1x8x8x4xbf16> to vector<8x8x4xbf16>
    %59 = vector.shape_cast %58 : vector<8x8x4xbf16> to vector<64x4xbf16>
    %c8 = arith.constant 8 : index
    %c0_60 = arith.constant 0 : index
    %c0_61 = arith.constant 0 : index
    %60 = vector.load %arg5[%c8, %c0_60, %c0_61] : memref<9x4x8xbf16, #tpu.memory_space<vmem>>, vector<1x4x8xbf16>
    %61 = vector.shape_cast %60 : vector<1x4x8xbf16> to vector<4x8xbf16>
    %cst_62 = arith.constant dense<0.000000e+00> : vector<64x8xf32>
    %62 = tpu.matmul %59, %61, %cst_62 {dimension_numbers = #tpu.dot_dimension_numbers<[1], [0], [0], [1], [0, 0, 1, 1], [], []>} : vector<64x4xbf16>, vector<4x8xbf16>, vector<64x8xf32> -> vector<64x8xf32>
    %63 = arith.addf %56, %62 : vector<64x8xf32>
    %c0_63 = arith.constant 0 : index
    %c0_64 = arith.constant 0 : index
    %64 = vector.load %arg6[%c0_63, %c0_64] : memref<1x8xf32, #tpu.memory_space<vmem>>, vector<1x8xf32>
    %65 = vector.broadcast %64 : vector<1x8xf32> to vector<64x8xf32>
    %66 = arith.mulf %63, %65 : vector<64x8xf32>
    %c0_65 = arith.constant 0 : index
    %c0_66 = arith.constant 0 : index
    %67 = vector.load %arg7[%c0_65, %c0_66] : memref<1x8xf32, #tpu.memory_space<vmem>>, vector<1x8xf32>
    %68 = vector.broadcast %67 : vector<1x8xf32> to vector<64x8xf32>
    %69 = arith.addf %66, %68 : vector<64x8xf32>
    %cst_67 = arith.constant 0.000000e+00 : f32
    %70 = vector.broadcast %cst_67 : f32 to vector<64x8xf32>
    %71 = arith.maximumf %69, %70 : vector<64x8xf32>
    %72 = vector.shape_cast %71 : vector<64x8xf32> to vector<8x8x8xf32>
    %73 = arith.truncf %72 : vector<8x8x8xf32> to vector<8x8x8xbf16>
    %c0_68 = arith.constant 0 : index
    %c0_69 = arith.constant 0 : index
    %c0_70 = arith.constant 0 : index
    %c0_71 = arith.constant 0 : index
    %74 = vector.load %arg8[%c0_68, %c0_69, %c0_70, %c0_71] : memref<1x8x8x8xbf16, #tpu.memory_space<vmem>>, vector<1x8x8x8xbf16>
    %75 = vector.shape_cast %74 : vector<1x8x8x8xbf16> to vector<8x8x8xbf16>
    %76 = vector.shape_cast %73 : vector<8x8x8xbf16> to vector<1x8x8x8xbf16>
    tpu.vector_store %arg8[%c0_68, %c0_69, %c0_70, %c0_71], %76 {strides = array<i32>} : memref<1x8x8x8xbf16, #tpu.memory_space<vmem>>, vector<1x8x8x8xbf16>,
    return
  }
  func.func @transform_0(%arg0: i32) -> (i32, i32, i32, i32) {
    %c0_i32 = arith.constant 0 : i32
    %c0_i32_0 = arith.constant 0 : i32
    %c0_i32_1 = arith.constant 0 : i32
    %c0_i32_2 = arith.constant 0 : i32
    return %arg0, %c0_i32, %c0_i32_0, %c0_i32_1 : i32, i32, i32, i32
  }
  func.func @transform_1(%arg0: i32) -> (i32, i32, i32, i32) {
    %c0_i32 = arith.constant 0 : i32
    %c0_i32_0 = arith.constant 0 : i32
    %c0_i32_1 = arith.constant 0 : i32
    %c0_i32_2 = arith.constant 0 : i32
    return %arg0, %c0_i32, %c0_i32_0, %c0_i32_1 : i32, i32, i32, i32
  }
  func.func @transform_2(%arg0: i32) -> (i32, i32, i32, i32) {
    %c0_i32 = arith.constant 0 : i32
    %c0_i32_0 = arith.constant 0 : i32
    %c0_i32_1 = arith.constant 0 : i32
    %c0_i32_2 = arith.constant 0 : i32
    return %arg0, %c0_i32, %c0_i32_0, %c0_i32_1 : i32, i32, i32, i32
  }
  func.func @transform_3(%arg0: i32) -> (i32, i32, i32, i32) {
    %c0_i32 = arith.constant 0 : i32
    %c0_i32_0 = arith.constant 0 : i32
    %c0_i32_1 = arith.constant 0 : i32
    %c0_i32_2 = arith.constant 0 : i32
    return %arg0, %c0_i32, %c0_i32_0, %c0_i32_1 : i32, i32, i32, i32
  }
  func.func @transform_4(%arg0: i32) -> (i32, i32, i32) {
    %c0_i32 = arith.constant 0 : i32
    %c0_i32_0 = arith.constant 0 : i32
    %c0_i32_1 = arith.constant 0 : i32
    %c0_i32_2 = arith.constant 0 : i32
    return %c0_i32, %c0_i32_0, %c0_i32_1 : i32, i32, i32
  }
  func.func @transform_5(%arg0: i32) -> (i32, i32) {
    %c0_i32 = arith.constant 0 : i32
    %c0_i32_0 = arith.constant 0 : i32
    %c0_i32_1 = arith.constant 0 : i32
    return %c0_i32, %c0_i32_0 : i32, i32
  }
  func.func @transform_6(%arg0: i32) -> (i32, i32) {
    %c0_i32 = arith.constant 0 : i32
    %c0_i32_0 = arith.constant 0 : i32
    %c0_i32_1 = arith.constant 0 : i32
    return %c0_i32, %c0_i32_0 : i32, i32
  }
  func.func @transform_7(%arg0: i32) -> (i32, i32, i32, i32) {
    %c0_i32 = arith.constant 0 : i32
    %c0_i32_0 = arith.constant 0 : i32
    %c0_i32_1 = arith.constant 0 : i32
    %c0_i32_2 = arith.constant 0 : i32
    return %arg0, %c0_i32, %c0_i32_0, %c0_i32_1 : i32, i32, i32, i32
  }
}

module attributes {stable_mosaic.version = 11 : i64} {
  func.func @_tap_conv_kernel(%arg0: i32, %arg1: memref<1x10x10x8xbf16, #tpu.memory_space<vmem>>, %arg2: memref<9x8x8xbf16, #tpu.memory_space<vmem>>, %arg3: memref<1x8xf32, #tpu.memory_space<vmem>>, %arg4: memref<1x8xf32, #tpu.memory_space<vmem>>, %arg5: memref<1x8x8x4xbf16, #tpu.memory_space<vmem>>, %arg6: memref<4x8xbf16, #tpu.memory_space<vmem>>, %arg7: memref<1x8xf32, #tpu.memory_space<vmem>>, %arg8: memref<1x8xf32, #tpu.memory_space<vmem>>, %arg9: memref<1x8x8x8xf32, #tpu.memory_space<vmem>>) attributes {dimension_semantics = [#tpu.dimension_semantics<parallel>], iteration_bounds = array<i64: 2>, scalar_prefetch = 0 : i64, scratch_operands = 0 : i64, tpu.core_type = #tpu.core_type<tc>, window_params = [{transform_indices = @transform_0, window_bounds = array<i64: 1, 10, 10, 8>}, {pipeline_mode = #tpu.pipeline_mode<synchronous>, transform_indices = @transform_1, window_bounds = array<i64: 9, 8, 8>}, {pipeline_mode = #tpu.pipeline_mode<synchronous>, transform_indices = @transform_2, window_bounds = array<i64: 1, 8>}, {pipeline_mode = #tpu.pipeline_mode<synchronous>, transform_indices = @transform_3, window_bounds = array<i64: 1, 8>}, {transform_indices = @transform_4, window_bounds = array<i64: 1, 8, 8, 4>}, {pipeline_mode = #tpu.pipeline_mode<synchronous>, transform_indices = @transform_5, window_bounds = array<i64: 4, 8>}, {pipeline_mode = #tpu.pipeline_mode<synchronous>, transform_indices = @transform_6, window_bounds = array<i64: 1, 8>}, {pipeline_mode = #tpu.pipeline_mode<synchronous>, transform_indices = @transform_7, window_bounds = array<i64: 1, 8>}, {transform_indices = @transform_8, window_bounds = array<i64: 1, 8, 8, 8>}]} {
    %cst = arith.constant 0.000000e+00 : f32
    %0 = vector.broadcast %cst : f32 to vector<64x8xf32>
    %c0 = arith.constant 0 : index
    %c0_0 = arith.constant 0 : index
    %c0_1 = arith.constant 0 : index
    %c0_2 = arith.constant 0 : index
    %1 = vector.load %arg1[%c0, %c0_0, %c0_1, %c0_2] : memref<1x10x10x8xbf16, #tpu.memory_space<vmem>>, vector<1x8x8x8xbf16>
    %2 = vector.shape_cast %1 : vector<1x8x8x8xbf16> to vector<8x8x8xbf16>
    %3 = vector.shape_cast %2 : vector<8x8x8xbf16> to vector<64x8xbf16>
    %c0_3 = arith.constant 0 : index
    %c0_4 = arith.constant 0 : index
    %c0_5 = arith.constant 0 : index
    %4 = vector.load %arg2[%c0_3, %c0_4, %c0_5] : memref<9x8x8xbf16, #tpu.memory_space<vmem>>, vector<1x8x8xbf16>
    %5 = vector.shape_cast %4 : vector<1x8x8xbf16> to vector<8x8xbf16>
    %cst_6 = arith.constant dense<0.000000e+00> : vector<64x8xf32>
    %6 = tpu.matmul %3, %5, %cst_6 {dimension_numbers = #tpu.dot_dimension_numbers<[1], [0], [0], [1], [0, 0, 1, 1], [], []>} : vector<64x8xbf16>, vector<8x8xbf16>, vector<64x8xf32> -> vector<64x8xf32>
    %7 = arith.addf %0, %6 : vector<64x8xf32>
    %c0_7 = arith.constant 0 : index
    %c0_8 = arith.constant 0 : index
    %c1 = arith.constant 1 : index
    %c0_9 = arith.constant 0 : index
    %8 = vector.load %arg1[%c0_7, %c0_8, %c1, %c0_9] : memref<1x10x10x8xbf16, #tpu.memory_space<vmem>>, vector<1x8x8x8xbf16>
    %9 = vector.shape_cast %8 : vector<1x8x8x8xbf16> to vector<8x8x8xbf16>
    %10 = vector.shape_cast %9 : vector<8x8x8xbf16> to vector<64x8xbf16>
    %c1_10 = arith.constant 1 : index
    %c0_11 = arith.constant 0 : index
    %c0_12 = arith.constant 0 : index
    %11 = vector.load %arg2[%c1_10, %c0_11, %c0_12] : memref<9x8x8xbf16, #tpu.memory_space<vmem>>, vector<1x8x8xbf16>
    %12 = vector.shape_cast %11 : vector<1x8x8xbf16> to vector<8x8xbf16>
    %cst_13 = arith.constant dense<0.000000e+00> : vector<64x8xf32>
    %13 = tpu.matmul %10, %12, %cst_13 {dimension_numbers = #tpu.dot_dimension_numbers<[1], [0], [0], [1], [0, 0, 1, 1], [], []>} : vector<64x8xbf16>, vector<8x8xbf16>, vector<64x8xf32> -> vector<64x8xf32>
    %14 = arith.addf %7, %13 : vector<64x8xf32>
    %c0_14 = arith.constant 0 : index
    %c0_15 = arith.constant 0 : index
    %c2 = arith.constant 2 : index
    %c0_16 = arith.constant 0 : index
    %15 = vector.load %arg1[%c0_14, %c0_15, %c2, %c0_16] : memref<1x10x10x8xbf16, #tpu.memory_space<vmem>>, vector<1x8x8x8xbf16>
    %16 = vector.shape_cast %15 : vector<1x8x8x8xbf16> to vector<8x8x8xbf16>
    %17 = vector.shape_cast %16 : vector<8x8x8xbf16> to vector<64x8xbf16>
    %c2_17 = arith.constant 2 : index
    %c0_18 = arith.constant 0 : index
    %c0_19 = arith.constant 0 : index
    %18 = vector.load %arg2[%c2_17, %c0_18, %c0_19] : memref<9x8x8xbf16, #tpu.memory_space<vmem>>, vector<1x8x8xbf16>
    %19 = vector.shape_cast %18 : vector<1x8x8xbf16> to vector<8x8xbf16>
    %cst_20 = arith.constant dense<0.000000e+00> : vector<64x8xf32>
    %20 = tpu.matmul %17, %19, %cst_20 {dimension_numbers = #tpu.dot_dimension_numbers<[1], [0], [0], [1], [0, 0, 1, 1], [], []>} : vector<64x8xbf16>, vector<8x8xbf16>, vector<64x8xf32> -> vector<64x8xf32>
    %21 = arith.addf %14, %20 : vector<64x8xf32>
    %c0_21 = arith.constant 0 : index
    %c1_22 = arith.constant 1 : index
    %c0_23 = arith.constant 0 : index
    %c0_24 = arith.constant 0 : index
    %22 = vector.load %arg1[%c0_21, %c1_22, %c0_23, %c0_24] : memref<1x10x10x8xbf16, #tpu.memory_space<vmem>>, vector<1x8x8x8xbf16>
    %23 = vector.shape_cast %22 : vector<1x8x8x8xbf16> to vector<8x8x8xbf16>
    %24 = vector.shape_cast %23 : vector<8x8x8xbf16> to vector<64x8xbf16>
    %c3 = arith.constant 3 : index
    %c0_25 = arith.constant 0 : index
    %c0_26 = arith.constant 0 : index
    %25 = vector.load %arg2[%c3, %c0_25, %c0_26] : memref<9x8x8xbf16, #tpu.memory_space<vmem>>, vector<1x8x8xbf16>
    %26 = vector.shape_cast %25 : vector<1x8x8xbf16> to vector<8x8xbf16>
    %cst_27 = arith.constant dense<0.000000e+00> : vector<64x8xf32>
    %27 = tpu.matmul %24, %26, %cst_27 {dimension_numbers = #tpu.dot_dimension_numbers<[1], [0], [0], [1], [0, 0, 1, 1], [], []>} : vector<64x8xbf16>, vector<8x8xbf16>, vector<64x8xf32> -> vector<64x8xf32>
    %28 = arith.addf %21, %27 : vector<64x8xf32>
    %c0_28 = arith.constant 0 : index
    %c1_29 = arith.constant 1 : index
    %c1_30 = arith.constant 1 : index
    %c0_31 = arith.constant 0 : index
    %29 = vector.load %arg1[%c0_28, %c1_29, %c1_30, %c0_31] : memref<1x10x10x8xbf16, #tpu.memory_space<vmem>>, vector<1x8x8x8xbf16>
    %30 = vector.shape_cast %29 : vector<1x8x8x8xbf16> to vector<8x8x8xbf16>
    %31 = vector.shape_cast %30 : vector<8x8x8xbf16> to vector<64x8xbf16>
    %c4 = arith.constant 4 : index
    %c0_32 = arith.constant 0 : index
    %c0_33 = arith.constant 0 : index
    %32 = vector.load %arg2[%c4, %c0_32, %c0_33] : memref<9x8x8xbf16, #tpu.memory_space<vmem>>, vector<1x8x8xbf16>
    %33 = vector.shape_cast %32 : vector<1x8x8xbf16> to vector<8x8xbf16>
    %cst_34 = arith.constant dense<0.000000e+00> : vector<64x8xf32>
    %34 = tpu.matmul %31, %33, %cst_34 {dimension_numbers = #tpu.dot_dimension_numbers<[1], [0], [0], [1], [0, 0, 1, 1], [], []>} : vector<64x8xbf16>, vector<8x8xbf16>, vector<64x8xf32> -> vector<64x8xf32>
    %35 = arith.addf %28, %34 : vector<64x8xf32>
    %c0_35 = arith.constant 0 : index
    %c1_36 = arith.constant 1 : index
    %c2_37 = arith.constant 2 : index
    %c0_38 = arith.constant 0 : index
    %36 = vector.load %arg1[%c0_35, %c1_36, %c2_37, %c0_38] : memref<1x10x10x8xbf16, #tpu.memory_space<vmem>>, vector<1x8x8x8xbf16>
    %37 = vector.shape_cast %36 : vector<1x8x8x8xbf16> to vector<8x8x8xbf16>
    %38 = vector.shape_cast %37 : vector<8x8x8xbf16> to vector<64x8xbf16>
    %c5 = arith.constant 5 : index
    %c0_39 = arith.constant 0 : index
    %c0_40 = arith.constant 0 : index
    %39 = vector.load %arg2[%c5, %c0_39, %c0_40] : memref<9x8x8xbf16, #tpu.memory_space<vmem>>, vector<1x8x8xbf16>
    %40 = vector.shape_cast %39 : vector<1x8x8xbf16> to vector<8x8xbf16>
    %cst_41 = arith.constant dense<0.000000e+00> : vector<64x8xf32>
    %41 = tpu.matmul %38, %40, %cst_41 {dimension_numbers = #tpu.dot_dimension_numbers<[1], [0], [0], [1], [0, 0, 1, 1], [], []>} : vector<64x8xbf16>, vector<8x8xbf16>, vector<64x8xf32> -> vector<64x8xf32>
    %42 = arith.addf %35, %41 : vector<64x8xf32>
    %c0_42 = arith.constant 0 : index
    %c2_43 = arith.constant 2 : index
    %c0_44 = arith.constant 0 : index
    %c0_45 = arith.constant 0 : index
    %43 = vector.load %arg1[%c0_42, %c2_43, %c0_44, %c0_45] : memref<1x10x10x8xbf16, #tpu.memory_space<vmem>>, vector<1x8x8x8xbf16>
    %44 = vector.shape_cast %43 : vector<1x8x8x8xbf16> to vector<8x8x8xbf16>
    %45 = vector.shape_cast %44 : vector<8x8x8xbf16> to vector<64x8xbf16>
    %c6 = arith.constant 6 : index
    %c0_46 = arith.constant 0 : index
    %c0_47 = arith.constant 0 : index
    %46 = vector.load %arg2[%c6, %c0_46, %c0_47] : memref<9x8x8xbf16, #tpu.memory_space<vmem>>, vector<1x8x8xbf16>
    %47 = vector.shape_cast %46 : vector<1x8x8xbf16> to vector<8x8xbf16>
    %cst_48 = arith.constant dense<0.000000e+00> : vector<64x8xf32>
    %48 = tpu.matmul %45, %47, %cst_48 {dimension_numbers = #tpu.dot_dimension_numbers<[1], [0], [0], [1], [0, 0, 1, 1], [], []>} : vector<64x8xbf16>, vector<8x8xbf16>, vector<64x8xf32> -> vector<64x8xf32>
    %49 = arith.addf %42, %48 : vector<64x8xf32>
    %c0_49 = arith.constant 0 : index
    %c2_50 = arith.constant 2 : index
    %c1_51 = arith.constant 1 : index
    %c0_52 = arith.constant 0 : index
    %50 = vector.load %arg1[%c0_49, %c2_50, %c1_51, %c0_52] : memref<1x10x10x8xbf16, #tpu.memory_space<vmem>>, vector<1x8x8x8xbf16>
    %51 = vector.shape_cast %50 : vector<1x8x8x8xbf16> to vector<8x8x8xbf16>
    %52 = vector.shape_cast %51 : vector<8x8x8xbf16> to vector<64x8xbf16>
    %c7 = arith.constant 7 : index
    %c0_53 = arith.constant 0 : index
    %c0_54 = arith.constant 0 : index
    %53 = vector.load %arg2[%c7, %c0_53, %c0_54] : memref<9x8x8xbf16, #tpu.memory_space<vmem>>, vector<1x8x8xbf16>
    %54 = vector.shape_cast %53 : vector<1x8x8xbf16> to vector<8x8xbf16>
    %cst_55 = arith.constant dense<0.000000e+00> : vector<64x8xf32>
    %55 = tpu.matmul %52, %54, %cst_55 {dimension_numbers = #tpu.dot_dimension_numbers<[1], [0], [0], [1], [0, 0, 1, 1], [], []>} : vector<64x8xbf16>, vector<8x8xbf16>, vector<64x8xf32> -> vector<64x8xf32>
    %56 = arith.addf %49, %55 : vector<64x8xf32>
    %c0_56 = arith.constant 0 : index
    %c2_57 = arith.constant 2 : index
    %c2_58 = arith.constant 2 : index
    %c0_59 = arith.constant 0 : index
    %57 = vector.load %arg1[%c0_56, %c2_57, %c2_58, %c0_59] : memref<1x10x10x8xbf16, #tpu.memory_space<vmem>>, vector<1x8x8x8xbf16>
    %58 = vector.shape_cast %57 : vector<1x8x8x8xbf16> to vector<8x8x8xbf16>
    %59 = vector.shape_cast %58 : vector<8x8x8xbf16> to vector<64x8xbf16>
    %c8 = arith.constant 8 : index
    %c0_60 = arith.constant 0 : index
    %c0_61 = arith.constant 0 : index
    %60 = vector.load %arg2[%c8, %c0_60, %c0_61] : memref<9x8x8xbf16, #tpu.memory_space<vmem>>, vector<1x8x8xbf16>
    %61 = vector.shape_cast %60 : vector<1x8x8xbf16> to vector<8x8xbf16>
    %cst_62 = arith.constant dense<0.000000e+00> : vector<64x8xf32>
    %62 = tpu.matmul %59, %61, %cst_62 {dimension_numbers = #tpu.dot_dimension_numbers<[1], [0], [0], [1], [0, 0, 1, 1], [], []>} : vector<64x8xbf16>, vector<8x8xbf16>, vector<64x8xf32> -> vector<64x8xf32>
    %63 = arith.addf %56, %62 : vector<64x8xf32>
    %c0_63 = arith.constant 0 : index
    %c0_64 = arith.constant 0 : index
    %64 = vector.load %arg3[%c0_63, %c0_64] : memref<1x8xf32, #tpu.memory_space<vmem>>, vector<1x8xf32>
    %65 = vector.broadcast %64 : vector<1x8xf32> to vector<64x8xf32>
    %66 = arith.mulf %63, %65 : vector<64x8xf32>
    %c0_65 = arith.constant 0 : index
    %c0_66 = arith.constant 0 : index
    %67 = vector.load %arg4[%c0_65, %c0_66] : memref<1x8xf32, #tpu.memory_space<vmem>>, vector<1x8xf32>
    %68 = vector.broadcast %67 : vector<1x8xf32> to vector<64x8xf32>
    %69 = arith.addf %66, %68 : vector<64x8xf32>
    %c0_67 = arith.constant 0 : index
    %c0_68 = arith.constant 0 : index
    %c0_69 = arith.constant 0 : index
    %c0_70 = arith.constant 0 : index
    %70 = vector.load %arg5[%c0_67, %c0_68, %c0_69, %c0_70] : memref<1x8x8x4xbf16, #tpu.memory_space<vmem>>, vector<1x8x8x4xbf16>
    %71 = vector.shape_cast %70 : vector<1x8x8x4xbf16> to vector<8x8x4xbf16>
    %72 = vector.shape_cast %71 : vector<8x8x4xbf16> to vector<64x4xbf16>
    %c0_71 = arith.constant 0 : index
    %c0_72 = arith.constant 0 : index
    %73 = vector.load %arg6[%c0_71, %c0_72] : memref<4x8xbf16, #tpu.memory_space<vmem>>, vector<4x8xbf16>
    %cst_73 = arith.constant dense<0.000000e+00> : vector<64x8xf32>
    %74 = tpu.matmul %72, %73, %cst_73 {dimension_numbers = #tpu.dot_dimension_numbers<[1], [0], [0], [1], [0, 0, 1, 1], [], []>} : vector<64x4xbf16>, vector<4x8xbf16>, vector<64x8xf32> -> vector<64x8xf32>
    %c0_74 = arith.constant 0 : index
    %c0_75 = arith.constant 0 : index
    %75 = vector.load %arg7[%c0_74, %c0_75] : memref<1x8xf32, #tpu.memory_space<vmem>>, vector<1x8xf32>
    %76 = vector.broadcast %75 : vector<1x8xf32> to vector<64x8xf32>
    %77 = arith.mulf %74, %76 : vector<64x8xf32>
    %78 = arith.addf %69, %77 : vector<64x8xf32>
    %c0_76 = arith.constant 0 : index
    %c0_77 = arith.constant 0 : index
    %79 = vector.load %arg8[%c0_76, %c0_77] : memref<1x8xf32, #tpu.memory_space<vmem>>, vector<1x8xf32>
    %80 = vector.broadcast %79 : vector<1x8xf32> to vector<64x8xf32>
    %81 = arith.addf %78, %80 : vector<64x8xf32>
    %cst_78 = arith.constant 0.000000e+00 : f32
    %82 = vector.broadcast %cst_78 : f32 to vector<64x8xf32>
    %83 = arith.maximumf %81, %82 : vector<64x8xf32>
    %84 = vector.shape_cast %83 : vector<64x8xf32> to vector<8x8x8xf32>
    %c0_79 = arith.constant 0 : index
    %c0_80 = arith.constant 0 : index
    %c0_81 = arith.constant 0 : index
    %c0_82 = arith.constant 0 : index
    %85 = vector.load %arg9[%c0_79, %c0_80, %c0_81, %c0_82] : memref<1x8x8x8xf32, #tpu.memory_space<vmem>>, vector<1x8x8x8xf32>
    %86 = vector.shape_cast %85 : vector<1x8x8x8xf32> to vector<8x8x8xf32>
    %87 = vector.shape_cast %84 : vector<8x8x8xf32> to vector<1x8x8x8xf32>
    tpu.vector_store %arg9[%c0_79, %c0_80, %c0_81, %c0_82], %87 {strides = array<i32>} : memref<1x8x8x8xf32, #tpu.memory_space<vmem>>, vector<1x8x8x8xf32>,
    return
  }
  func.func @transform_0(%arg0: i32) -> (i32, i32, i32, i32) {
    %c0_i32 = arith.constant 0 : i32
    %c0_i32_0 = arith.constant 0 : i32
    %c0_i32_1 = arith.constant 0 : i32
    %c0_i32_2 = arith.constant 0 : i32
    return %arg0, %c0_i32, %c0_i32_0, %c0_i32_1 : i32, i32, i32, i32
  }
  func.func @transform_1(%arg0: i32) -> (i32, i32, i32) {
    %c0_i32 = arith.constant 0 : i32
    %c0_i32_0 = arith.constant 0 : i32
    %c0_i32_1 = arith.constant 0 : i32
    %c0_i32_2 = arith.constant 0 : i32
    return %c0_i32, %c0_i32_0, %c0_i32_1 : i32, i32, i32
  }
  func.func @transform_2(%arg0: i32) -> (i32, i32) {
    %c0_i32 = arith.constant 0 : i32
    %c0_i32_0 = arith.constant 0 : i32
    %c0_i32_1 = arith.constant 0 : i32
    return %c0_i32, %c0_i32_0 : i32, i32
  }
  func.func @transform_3(%arg0: i32) -> (i32, i32) {
    %c0_i32 = arith.constant 0 : i32
    %c0_i32_0 = arith.constant 0 : i32
    %c0_i32_1 = arith.constant 0 : i32
    return %c0_i32, %c0_i32_0 : i32, i32
  }
  func.func @transform_4(%arg0: i32) -> (i32, i32, i32, i32) {
    %c0_i32 = arith.constant 0 : i32
    %c0_i32_0 = arith.constant 0 : i32
    %c0_i32_1 = arith.constant 0 : i32
    %c0_i32_2 = arith.constant 0 : i32
    return %arg0, %c0_i32, %c0_i32_0, %c0_i32_1 : i32, i32, i32, i32
  }
  func.func @transform_5(%arg0: i32) -> (i32, i32) {
    %c0_i32 = arith.constant 0 : i32
    %c0_i32_0 = arith.constant 0 : i32
    %c0_i32_1 = arith.constant 0 : i32
    return %c0_i32, %c0_i32_0 : i32, i32
  }
  func.func @transform_6(%arg0: i32) -> (i32, i32) {
    %c0_i32 = arith.constant 0 : i32
    %c0_i32_0 = arith.constant 0 : i32
    %c0_i32_1 = arith.constant 0 : i32
    return %c0_i32, %c0_i32_0 : i32, i32
  }
  func.func @transform_7(%arg0: i32) -> (i32, i32) {
    %c0_i32 = arith.constant 0 : i32
    %c0_i32_0 = arith.constant 0 : i32
    %c0_i32_1 = arith.constant 0 : i32
    return %c0_i32, %c0_i32_0 : i32, i32
  }
  func.func @transform_8(%arg0: i32) -> (i32, i32, i32, i32) {
    %c0_i32 = arith.constant 0 : i32
    %c0_i32_0 = arith.constant 0 : i32
    %c0_i32_1 = arith.constant 0 : i32
    %c0_i32_2 = arith.constant 0 : i32
    return %arg0, %c0_i32, %c0_i32_0, %c0_i32_1 : i32, i32, i32, i32
  }
}

</mosaic_0001>

<bundles_post_ra>
// kernel: basic_block_forward.2
= control target key start
LH: loop header
LB: loop body
LE: loop exit
PB: predicated region body
PF: predicated region fallthrough
CT: control target
= control target key end

     0   :  { %s1816_s24 = smov 0   ;;  %s2196_s0 = inlined_call_operand.vmem [shape: bf16[2,9,9,4], index: 0, kind: input, shape index: {}]   ;;  %s2197_s1 = inlined_call_operand.vmem [shape: bf16[2,9,9,4], index: 1, kind: input, shape index: {}]   ;;  %s2198_s2 = inlined_call_operand.vmem [shape: bf16[2,9,9,4], index: 2, kind: input, shape index: {}]   ;;  %s2199_s3 = inlined_call_operand.vmem [shape: bf16[2,9,9,4], index: 3, kind: input, shape index: {}]   ;;  %s2200_s4 = inlined_call_operand.vmem [shape: bf16[9,4,8], index: 4, kind: input, shape index: {}]   ;;  %s2201_s5 = inlined_call_operand.vmem [shape: f32[1,8], index: 5, kind: input, shape index: {}]   ;;  %s2202_s6 = inlined_call_operand.vmem [shape: f32[1,8], index: 6, kind: input, shape index: {}]   ;;  %s2203_s7 = inlined_call_operand.vmem [shape: bf16[2,8,8,8], index: 7, kind: output, shape index: {}]  }
   0x1 LB: > { %s1544_s25 = sadd.s32 4294967295, %s1774_s24   ;;  %p1548_p0 = scmp.ge.s32.totalorder %s1774_s24, 1  ;;  %s1774_s24 = sphi %s1816_s24, %s17_s24  }
   0x2   : > { %p267_p1 = scmp.lt.s32.totalorder %s1774_s24, 3 }
   0x4   : > { %p268_p2 = pnand %p1548_p0, %p267_p1 }
   0x5   : > { %p314_p3 = scmp.lt.s32.totalorder (!%p268_p2), %s1544_s25, 1 }
   0x6   : > { %271 = sbr.rel (%p268_p2) target bundleno = 303 (0x12f), region = 48 }
   0xb   : > { %v1555_v0 = vld [vmem:[%s2200_s4 + $0x2] sm:$0x3]  ;;  %vm392_vm0 = vcmask 1041408   ;;  %v1596_v2 = vld [vmem:[%s2200_s4 + $0x4] sm:$0x3]  ;;  %s2207_s25 = smov (!%p314_p3, %s1544_s25), 1 }
   0xc   : > { %v394_v1 = vsel %vm392_vm0, %v1555_v0, 0  ;;  %v1601_v3 = vld [vmem:[%s2200_s4 + $0x6] sm:$0x3]  ;;  %v647_v4 = vsel %vm392_vm0, %v1596_v2, 0  ;;  %v348_v6 = vld [vmem:[%s2200_s4] sm:$0x3] }
   0xd   : > { %1754 = vmatpush.bf16.msra.mxu1 %v394_v1  ;;  %1755 = vmatpush.bf16.msra.mxu2 %v394_v1  ;;  %v729_v5 = vsel %vm392_vm0, %v1601_v3, 0  ;;  %v458_v7 = vsel %vm392_vm0, %v348_v6, 0  ;;  %v1622_v8 = vld [vmem:[%s2200_s4 + $0x8] sm:$0x3]  ;;  %s1846_s13 = smul.u32 72, %s2207_s25  ;;  %vm379_vm1 = vcmask 31744  }
   0xe   : > { %1756 = vmatpush.bf16.msra.mxu3 %v394_v1  ;;  %403 = vmatpush.bf16.msra.mxu0 %v394_v1  ;;  %v811_v9 = vsel %vm392_vm0, %v1622_v8, 0  ;;  %v1656_v10 = vld [vmem:[%s2200_s4 + $0xc] sm:$0x3]  ;;  %v1685_v11 = vld [vmem:[%s2200_s4 + $0xe] sm:$0x3]  ;;  %s1729_s17 = sshll.u32 %s2207_s25, 5 }
   0xf   : > { %s1856_s18 = scalar_lea.vmem %s2197_s1, %s1846_s13  ;;  %v1643_v12 = vld [vmem:[%s2200_s4 + $0xa] sm:$0x3]  ;;  %s1868_s27 = scalar_lea.vmem %s2196_s0, %s1846_s13  ;;  %v1088_v24 = vsel %vm392_vm0, %v1656_v10, 0  ;;  %v1171_v28 = vsel %vm392_vm0, %v1685_v11, 0  ;;  %v1722_v38 = vld [vmem:[%s2200_s4 + $0x10] sm:$0x3] }
  0x10   : > { %v1562_v13 = vld [vmem:[%s1856_s18 + $0x10] sm:$0xf]  ;;  %v1735_v14 = vld [vmem:[%s1856_s18 + $0x14] sm:$0xf0]  ;;  %v1566_v15 = vld [vmem:[%s1856_s18 + $0x20] sm:$0xf]  ;;  %s1897_s9 = scalar_lea.vmem %s2198_s2, %s1846_s13  ;;  %s1910_s12 = scalar_lea.vmem %s2199_s3, %s1846_s13 }
  0x11   : > { %656 = vmatpush.bf16.msrb.mxu2 %v647_v4  ;;  %467 = vmatpush.bf16.msrb.mxu1 %v458_v7  ;;  %v1563_v16 = vor.u32 %v1735_v14, %v1562_v13  ;;  %v1736_v17 = vld [vmem:[%s1856_s18 + $0x24] sm:$0xf0]  ;;  %v1570_v18 = vld [vmem:[%s1856_s18 + $0x30] sm:$0xf]  ;;  %v1737_v19 = vld [vmem:[%s1856_s18 + $0x34] sm:$0xf0]  ;;  %s2138_s20 = scalar_lea.vmem %s2203_s7, %s1729_s17 }
  0x12   : > { %738 = vmatpush.bf16.msrb.mxu3 %v729_v5  ;;  %820 = vmatpush.bf16.msrb.mxu0 %v811_v9  ;;  %v1567_v20 = vor.u32 %v1736_v17, %v1566_v15  ;;  %v1571_v21 = vor.u32 %v1737_v19, %v1570_v18  ;;  %v1558_v22 = vld [vmem:[%s1856_s18] sm:$0xf]  ;;  %v1734_v23 = vld [vmem:[%s1856_s18 + $0x4] sm:$0xf0]  ;;  %v490_v27 = vld [vmem:[%s1868_s27 + $0x4] sm:$0x1] }
  0x13   : > { %1573 = vmatmul.msk.bf16.vlgmr.msra.gmra.mxu1 %vm379_vm1, %v1563_v16  ;;  %v1559_v25 = vor.u32 %v1734_v23, %v1558_v22  ;;  %v489_v26 = vld [vmem:[%s1868_s27] sm:$0xf]  ;;  %v1005_v29 = vsel %vm392_vm0, %v1643_v12, 0  ;;  %v491_v30 = vld [vmem:[%s1868_s27 + $0x8] sm:$0xf]  ;;  %v518_v34 = vshll.u32 %v490_v27, 16 }
  0x14   : > { %1574 = vmatmul.msk.bf16.vlgmr.msra.gmra.mxu2 %vm379_vm1, %v1567_v20  ;;  %1575 = vmatmul.msk.bf16.vlgmr.msra.gmra.mxu3 %vm379_vm1, %v1571_v21  ;;  %v492_v31 = vld [vmem:[%s1868_s27 + $0xc] sm:$0x1]  ;;  %v509_v32 = vshrl.u32 %v489_v26, 16  ;;  %v512_v33 = vshll.u32 %v489_v26, 16  ;;  %v523_v35 = vshrl.u32 %v491_v30, 16  ;;  %v526_v36 = vshll.u32 %v491_v30, 16 }
  0x15   : > { %1572 = vmatmul.msk.bf16.vlgmr.msra.gmra.mxu0 %vm379_vm1, %v1559_v25  ;;  %v532_v37 = vshll.u32 %v492_v31, 16  ;;  %1097 = vmatpush.bf16.msra.mxu2 %v1088_v24  ;;  %vm505_vm2 = vsmask.f32 3328  ;;  %vm506_vm3 = vsmask.f32 7440  ;;  %v520_v44 = vrot.slane %v518_v34, 5 }
  0x16   : > { %v511_v39 = vrot.slane %v509_v32, 4  ;;  %v514_v40 = vrot.slane %v512_v33, 5  ;;  %1180 = vmatpush.bf16.msra.mxu3 %v1171_v28  ;;  %1014 = vmatpush.bf16.msra.mxu1 %v1005_v29  ;;  %v525_v41 = vrot.slane %v523_v35, 4  ;;  %v528_v42 = vrot.slane %v526_v36, 5  ;;  %vm1899_vm4 = vmor %vm505_vm2, %vm506_vm3  ;;  %v493_v49 = vld [vmem:[%s1868_s27 + $0x10] sm:$0xf] }
  0x17   : > { %v1365_v45 = vsel %vm392_vm0, %v1722_v38, 0  ;;  %v534_v48 = vrot.slane %v532_v37, 5  ;;  %v495_v50 = vld [vmem:[%s1868_s27 + $0x18] sm:$0xf]  ;;  %v1578_v51 = vld [vmem:[%s1868_s27] sm:$0xf] }
  0x18   : > { %v515_v43 = vor.u32 %v514_v40, %v511_v39  ;;  %v529_v47 = vor.u32 %v528_v42, %v525_v41  ;;  %1374 = vmatpush.bf16.msra.mxu0 %v1365_v45  ;;  %v537_v53 = vshrl.u32 %v493_v49, 16  ;;  %v540_v54 = vshll.u32 %v493_v49, 16  ;;  %v1730_v55 = vld [vmem:[%s1868_s27 + $0x4] sm:$0xf0]  ;;  %v1604_v60 = vld [vmem:[%s1897_s9] sm:$0xf] }
  0x19   : > { %v551_v57 = vshrl.u32 %v495_v50, 16  ;;  %v554_v58 = vshll.u32 %v495_v50, 16  ;;  %v1738_v61 = vld [vmem:[%s1897_s9 + $0x4] sm:$0xf0]  ;;  %v1625_v2 = vld [vmem:[%s1910_s12] sm:$0xf]  ;;  %v1579_v9 = vor.u32 %v1730_v55, %v1578_v51 }
  0x1a   : > { %v516_v52 = vrot.slane %v515_v43, 4  ;;  %v530_v56 = vrot.slane %v529_v47, 4  ;;  %v539_v62 = vrot.slane %v537_v53, 4  ;;  %v542_v63 = vrot.slane %v540_v54, 5  ;;  %v1742_v3 = vld [vmem:[%s1910_s12 + $0x4] sm:$0xf0] }
  0x1b   : > { %v553_v4 = vrot.slane %v551_v57, 4  ;;  %v556_v5 = vrot.slane %v554_v58, 5  ;;  %v494_v7 = vld [vmem:[%s1868_s27 + $0x14] sm:$0x1]  ;;  %v496_v8 = vld [vmem:[%s1868_s27 + $0x1c] sm:$0x1]  ;;  %v1605_v11 = vor.u32 %v1738_v61, %v1604_v60  ;;  %v1626_v12 = vor.u32 %v1742_v3, %v1625_v2 }
  0x1c   : > { %v521_v59 = vsel %vm1899_vm4, %v516_v52, %v520_v44  ;;  %v535_v0 = vsel %vm1899_vm4, %v530_v56, %v534_v48  ;;  %v543_v13 = vor.u32 %v542_v63, %v539_v62  ;;  %v546_v14 = vshll.u32 %v494_v7, 16  ;;  %v497_v21 = vld [vmem:[%s1868_s27 + $0x20] sm:$0xf]  ;;  %v499_v22 = vld [vmem:[%s1868_s27 + $0x28] sm:$0xf] }
  0x1d   : > { %v622_v1 = vunpack.c.l.b16 %v521_v59  ;;  %v623_v6 = vunpack.c.l.b16 %v535_v0  ;;  %v557_v15 = vor.u32 %v556_v5, %v553_v4  ;;  %v560_v16 = vshll.u32 %v496_v8, 16  ;;  %v1582_v29 = vld [vmem:[%s1868_s27 + $0x10] sm:$0xf]  ;;  %v1731_v30 = vld [vmem:[%s1868_s27 + $0x14] sm:$0xf0] }
  0x1e   : > { %v544_v17 = vrot.slane %v543_v13, 4  ;;  %v548_v18 = vrot.slane %v546_v14, 5  ;;  %v565_v23 = vshrl.u32 %v497_v21, 16  ;;  %v568_v24 = vshll.u32 %v497_v21, 16  ;;  %v1608_v33 = vld [vmem:[%s1897_s9 + $0x10] sm:$0xf] }
  0x1f   : > { %v630_v10 = vpack.c.b16 %v623_v6, %v622_v1  ;;  %v558_v19 = vrot.slane %v557_v15, 4  ;;  %v562_v20 = vrot.slane %v560_v16, 5  ;;  %v579_v27 = vshrl.u32 %v499_v22, 16  ;;  %v1739_v34 = vld [vmem:[%s1897_s9 + $0x14] sm:$0xf0] }
  0x20   : > { %v549_v25 = vsel %vm1899_vm4, %v544_v17, %v548_v18  ;;  %v582_v28 = vshll.u32 %v499_v22, 16  ;;  %v1629_v35 = vld [vmem:[%s1910_s12 + $0x10] sm:$0xf]  ;;  %v1743_v36 = vld [vmem:[%s1910_s12 + $0x14] sm:$0xf0]  ;;  %v567_v37 = vrot.slane %v565_v23, 4  ;;  %v1583_v43 = vor.u32 %v1731_v30, %v1582_v29 }
  0x21   : > { %v563_v26 = vsel %vm1899_vm4, %v558_v19, %v562_v20  ;;  %v624_v31 = vunpack.c.l.b16 %v549_v25  ;;  %v570_v38 = vrot.slane %v568_v24, 5  ;;  %v581_v39 = vrot.slane %v579_v27, 4  ;;  %v498_v41 = vld [vmem:[%s1868_s27 + $0x24] sm:$0x1]  ;;  %v500_v42 = vld [vmem:[%s1868_s27 + $0x2c] sm:$0x1] }
  0x22   : > { %v625_v32 = vunpack.c.l.b16 %v563_v26  ;;  %v584_v40 = vrot.slane %v582_v28, 5  ;;  %v1609_v45 = vor.u32 %v1739_v34, %v1608_v33  ;;  %v1630_v47 = vor.u32 %v1743_v36, %v1629_v35  ;;  %v501_v52 = vld [vmem:[%s1868_s27 + $0x30] sm:$0xf]  ;;  %v503_v53 = vld [vmem:[%s1868_s27 + $0x38] sm:$0xf] }
  0x23   : > { %1592 = vmatmul.msk.bf16.vlgmr.msrb.gmra.mxu1 %vm379_vm1, %v1579_v9  ;;  %v571_v48 = vor.u32 %v570_v38, %v567_v37  ;;  %v574_v49 = vshll.u32 %v498_v41, 16  ;;  %v588_v51 = vshll.u32 %v500_v42, 16  ;;  %v593_v58 = vshrl.u32 %v501_v52, 16  ;;  %v502_v4 = vld [vmem:[%s1868_s27 + $0x34] sm:$0x1] }
  0x24   : > { %1597 = vmatmul.msk.bf16.vlgmr.msrb.gmra.mxu2 %vm379_vm1, %v630_v10  ;;  %1618 = vmatmul.msk.bf16.vlgmr.msrb.gmra.mxu3 %vm379_vm1, %v1605_v11  ;;  %v631_v44 = vpack.c.b16 %v625_v32, %v624_v31  ;;  %v585_v50 = vor.u32 %v584_v40, %v581_v39  ;;  %v596_v59 = vshll.u32 %v501_v52, 16  ;;  %v607_v60 = vshrl.u32 %v503_v53, 16  ;;  %v504_v5 = vld [vmem:[%s1868_s27 + $0x3c] sm:$0x1]  ;;  %v1586_v6 = vld [vmem:[%s1868_s27 + $0x20] sm:$0xf] }
  0x25   : > { %1639 = vmatmul.msk.bf16.vlgmr.msrb.gmra.mxu0 %vm379_vm1, %v1626_v12  ;;  %v572_v54 = vrot.slane %v571_v48, 4  ;;  %v576_v55 = vrot.slane %v574_v49, 5  ;;  %v590_v57 = vrot.slane %v588_v51, 5  ;;  %v610_v61 = vshll.u32 %v503_v53, 16  ;;  %v1732_v7 = vld [vmem:[%s1868_s27 + $0x24] sm:$0xf0] }
  0x26   : > { %v586_v56 = vrot.slane %v585_v50, 4  ;;  %v595_v0 = vrot.slane %v593_v58, 4  ;;  %v598_v1 = vrot.slane %v596_v59, 5  ;;  %v609_v2 = vrot.slane %v607_v60, 4  ;;  %v1612_v10 = vld [vmem:[%s1897_s9 + $0x20] sm:$0xf] }
  0x27   : > { %v577_v62 = vsel %vm1899_vm4, %v572_v54, %v576_v55  ;;  %v612_v3 = vrot.slane %v610_v61, 5  ;;  %v1740_v11 = vld [vmem:[%s1897_s9 + $0x24] sm:$0xf0]  ;;  %v1633_v12 = vld [vmem:[%s1910_s12 + $0x20] sm:$0xf]  ;;  %v602_v15 = vshll.u32 %v502_v4, 16  ;;  %v1587_v18 = vor.u32 %v1732_v7, %v1586_v6 }
  0x28   : > { %v591_v63 = vsel %vm1899_vm4, %v586_v56, %v590_v57  ;;  %v626_v8 = vunpack.c.l.b16 %v577_v62  ;;  %v1744_v13 = vld [vmem:[%s1910_s12 + $0x24] sm:$0xf0]  ;;  %v599_v14 = vor.u32 %v598_v1, %v595_v0  ;;  %v616_v17 = vshll.u32 %v504_v5, 16  ;;  %v850_v26 = vld [vmem:[%s1897_s9] sm:$0xf] }
  0x29   : > { %v627_v9 = vunpack.c.l.b16 %v591_v63  ;;  %v613_v16 = vor.u32 %v612_v3, %v609_v2  ;;  %v1613_v20 = vor.u32 %v1740_v11, %v1612_v10  ;;  %v1634_v21 = vor.u32 %v1744_v13, %v1633_v12  ;;  %v852_v27 = vld [vmem:[%s1897_s9 + $0x8] sm:$0xf]  ;;  %v1708_v29 = vld [vmem:[%s1868_s27 + $0x10] sm:$0xf]  ;;  %v1733_v41 = vld [vmem:[%s1868_s27 + $0x34] sm:$0xf0] }
  0x2a   : > { %v600_v22 = vrot.slane %v599_v14, 4  ;;  %v604_v23 = vrot.slane %v602_v15, 5  ;;  %v618_v25 = vrot.slane %v616_v17, 5  ;;  %v1706_v28 = vld [vmem:[%s1868_s27 + $0x8] sm:$0xf]  ;;  %v867_v32 = vshrl.u32 %v850_v26, 16 }
  0x2b   : > { %v632_v19 = vpack.c.b16 %v627_v9, %v626_v8  ;;  %v614_v24 = vrot.slane %v613_v16, 4  ;;  %v870_v33 = vshll.u32 %v850_v26, 16  ;;  %v881_v34 = vshrl.u32 %v852_v27, 16  ;;  %v1590_v40 = vld [vmem:[%s1868_s27 + $0x30] sm:$0xf] }
  0x2c   : > { %v605_v30 = vsel %vm1899_vm4, %v600_v22, %v604_v23  ;;  %v884_v35 = vshll.u32 %v852_v27, 16  ;;  %v1227_v36 = vshrl.u32 %v1706_v28, 16  ;;  %v1230_v37 = vshll.u32 %v1706_v28, 16  ;;  %v853_v52 = vld [vmem:[%s1897_s9 + $0xc] sm:$0x1] }
  0x2d   : > { %v619_v31 = vsel %vm1899_vm4, %v614_v24, %v618_v25  ;;  %v1241_v38 = vshrl.u32 %v1708_v29, 16  ;;  %v1244_v39 = vshll.u32 %v1708_v29, 16  ;;  %v628_v42 = vunpack.c.l.b16 %v605_v30  ;;  %v1707_v57 = vld [vmem:[%s1868_s27 + $0xc] sm:$0x1]  ;;  %v1709_v58 = vld [vmem:[%s1868_s27 + $0x14] sm:$0x1] }
  0x2e   : > { %v869_v48 = vrot.slane %v867_v32, 4  ;;  %v872_v49 = vrot.slane %v870_v33, 5  ;;  %v883_v50 = vrot.slane %v881_v34, 4  ;;  %v886_v51 = vrot.slane %v884_v35, 5  ;;  %v1637_v62 = vld [vmem:[%s1910_s12 + $0x30] sm:$0xf] }
  0x2f   : > { %v1229_v53 = vrot.slane %v1227_v36, 4  ;;  %v1232_v54 = vrot.slane %v1230_v37, 5  ;;  %v1243_v55 = vrot.slane %v1241_v38, 4  ;;  %v1246_v56 = vrot.slane %v1244_v39, 5  ;;  %v1745_v63 = vld [vmem:[%s1910_s12 + $0x34] sm:$0xf0] }
  0x30   : > { %v1591_v59 = vor.u32 %v1733_v41, %v1590_v40  ;;  %v873_v0 = vor.u32 %v872_v49, %v869_v48  ;;  %v887_v2 = vor.u32 %v886_v51, %v883_v50  ;;  %v890_v3 = vshll.u32 %v853_v52, 16  ;;  %v854_v9 = vld [vmem:[%s1897_s9 + $0x10] sm:$0xf]  ;;  %v856_v10 = vld [vmem:[%s1897_s9 + $0x18] sm:$0xf] }
  0x31   : > { %v1233_v4 = vor.u32 %v1232_v54, %v1229_v53  ;;  %v1236_v5 = vshll.u32 %v1707_v57, 16  ;;  %v1247_v6 = vor.u32 %v1246_v56, %v1243_v55  ;;  %v1250_v7 = vshll.u32 %v1709_v58, 16  ;;  %v1710_v23 = vld [vmem:[%s1868_s27 + $0x18] sm:$0xf]  ;;  %v1712_v24 = vld [vmem:[%s1868_s27 + $0x20] sm:$0xf] }
  0x32   : > { %v1638_v8 = vor.u32 %v1745_v63, %v1637_v62  ;;  %v874_v11 = vrot.slane %v873_v0, 4  ;;  %v888_v13 = vrot.slane %v887_v2, 4  ;;  %v892_v14 = vrot.slane %v890_v3, 5  ;;  %v855_v29 = vld [vmem:[%s1897_s9 + $0x14] sm:$0x1] }
  0x33   : > { %1593 = vmatmul.msk.bf16.gmra.mxu1 %vm379_vm1, %v1583_v43  ;;  %v629_v43 = vunpack.c.l.b16 %v619_v31  ;;  %v1234_v15 = vrot.slane %v1233_v4, 4  ;;  %v1238_v16 = vrot.slane %v1236_v5, 5  ;;  %v1248_v17 = vrot.slane %v1247_v6, 4  ;;  %v857_v34 = vld [vmem:[%s1897_s9 + $0x1c] sm:$0x1] }
  0x34   : > { %1598 = vmatmul.msk.bf16.gmra.mxu2 %vm379_vm1, %v631_v44  ;;  %1619 = vmatmul.msk.bf16.gmra.mxu3 %vm379_vm1, %v1609_v45  ;;  %v1616_v44 = vld [vmem:[%s1897_s9 + $0x30] sm:$0xf]  ;;  %v1741_v45 = vld [vmem:[%s1897_s9 + $0x34] sm:$0xf0]  ;;  %v912_v22 = vshll.u32 %v856_v10, 16  ;;  %v893_v26 = vsel %vm1899_vm4, %v888_v13, %v892_v14  ;;  %v1255_v35 = vshrl.u32 %v1710_v23, 16 }
  0x35   : > { %1640 = vmatmul.msk.bf16.gmra.mxu0 %vm379_vm1, %v1630_v47  ;;  %v851_v47 = vld [vmem:[%s1897_s9 + $0x4] sm:$0x1]  ;;  %v633_v60 = vpack.c.b16 %v629_v43, %v628_v42  ;;  %v1617_v61 = vor.u32 %v1741_v45, %v1616_v44  ;;  %v1239_v27 = vsel %vm1899_vm4, %v1234_v15, %v1238_v16  ;;  %v1258_v36 = vshll.u32 %v1710_v23, 16  ;;  %v1659_v41 = vld [vmem:[%s1868_s27 + $0x8] sm:$0xf] }
  0x36   : > { %v876_v1 = vshll.u32 %v851_v47, 16  ;;  %v914_v33 = vrot.slane %v912_v22, 5  ;;  %v1269_v37 = vshrl.u32 %v1712_v24, 16  ;;  %v1272_v38 = vshll.u32 %v1712_v24, 16  ;;  %v1746_v42 = vld [vmem:[%s1868_s27 + $0xc] sm:$0xf0] }
  0x37   : > { %v981_v40 = vunpack.c.l.b16 %v893_v26  ;;  %v1340_v43 = vunpack.c.l.b16 %v1239_v27  ;;  %v1688_v45 = vld [vmem:[%s1856_s18 + $0x8] sm:$0xf]  ;;  %v1750_v47 = vld [vmem:[%s1856_s18 + $0xc] sm:$0xf0]  ;;  %v904_v49 = vshll.u32 %v855_v29, 16  ;;  %v918_v51 = vshll.u32 %v857_v34, 16 }
  0x38   : > { %v878_v12 = vrot.slane %v876_v1, 5  ;;  %v1257_v52 = vrot.slane %v1255_v35, 4  ;;  %v1260_v53 = vrot.slane %v1258_v36, 5  ;;  %v1271_v54 = vrot.slane %v1269_v37, 4  ;;  %v1711_v57 = vld [vmem:[%s1868_s27 + $0x1c] sm:$0x1] }
  0x39   : > { %v1274_v55 = vrot.slane %v1272_v38, 5  ;;  %v1713_v58 = vld [vmem:[%s1868_s27 + $0x24] sm:$0x1]  ;;  %v906_v63 = vrot.slane %v904_v49, 5  ;;  %v920_v1 = vrot.slane %v918_v51, 5  ;;  %v1264_v3 = vshll.u32 %v1711_v57, 16 }
  0x3a   : > { %v879_v25 = vsel %vm1899_vm4, %v874_v11, %v878_v12  ;;  %v1261_v2 = vor.u32 %v1260_v53, %v1257_v52  ;;  %v1278_v5 = vshll.u32 %v1713_v58, 16  ;;  %v858_v6 = vld [vmem:[%s1897_s9 + $0x20] sm:$0xf]  ;;  %v1716_v15 = vld [vmem:[%s1868_s27 + $0x30] sm:$0xf]  ;;  %vm1444_vm5 = vcmask 60416  }
  0x3b   : > { %v980_v39 = vunpack.c.l.b16 %v879_v25  ;;  %v1275_v4 = vor.u32 %v1274_v55, %v1271_v54  ;;  %v1266_v12 = vrot.slane %v1264_v3, 5  ;;  %v923_v16 = vshrl.u32 %v858_v6, 16  ;;  %v1747_v29 = vld [vmem:[%s1868_s27 + $0x1c] sm:$0xf0]  ;;  %v859_v35 = vld [vmem:[%s1897_s9 + $0x24] sm:$0x1] }
  0x3c   : > { %v1262_v11 = vrot.slane %v1261_v2, 4  ;;  %v1280_v14 = vrot.slane %v1278_v5, 5  ;;  %v1297_v22 = vshrl.u32 %v1716_v15, 16  ;;  %v1300_v23 = vshll.u32 %v1716_v15, 16  ;;  %v861_v36 = vld [vmem:[%s1897_s9 + $0x2c] sm:$0x1] }
  0x3d   : > { %v988_v56 = vpack.c.b16 %v981_v40, %v980_v39  ;;  %v1276_v13 = vrot.slane %v1275_v4, 4  ;;  %v1751_v39 = vld [vmem:[%s1856_s18 + $0x1c] sm:$0xf0]  ;;  %v932_v49 = vshll.u32 %v859_v35, 16  ;;  %v946_v51 = vshll.u32 %v861_v36, 16 }
  0x3e   : > { %v1267_v26 = vsel %vm1899_vm4, %v1262_v11, %v1266_v12  ;;  %v862_v3 = vld [vmem:[%s1897_s9 + $0x30] sm:$0xf]  ;;  %v864_v4 = vld [vmem:[%s1897_s9 + $0x38] sm:$0xf] }
  0x3f   : > { %v1281_v27 = vsel %vm1899_vm4, %v1276_v13, %v1280_v14  ;;  %v1342_v40 = vunpack.c.l.b16 %v1267_v26  ;;  %v965_v11 = vshrl.u32 %v864_v4, 16  ;;  %v968_v12 = vshll.u32 %v864_v4, 16  ;;  %v1700_v4 = vld [vmem:[%s1856_s18 + $0x38] sm:$0xf] }
  0x43   : > { %1594 = vmatmul.msk.bf16.gmra.mxu1 %vm379_vm1, %v1587_v18  ;;  %v1252_v18 = vrot.slane %v1250_v7, 5  ;;  %v860_v7 = vld [vmem:[%s1897_s9 + $0x28] sm:$0xf] }
  0x44   : > { %1599 = vmatmul.msk.bf16.gmra.mxu2 %vm379_vm1, %v632_v19  ;;  %1620 = vmatmul.msk.bf16.gmra.mxu3 %vm379_vm1, %v1613_v20  ;;  %v895_v19 = vshrl.u32 %v854_v9, 16  ;;  %v898_v20 = vshll.u32 %v854_v9, 16 }
  0x45   : > { %1641 = vmatmul.msk.bf16.gmra.mxu0 %vm379_vm1, %v1634_v21  ;;  %v909_v21 = vshrl.u32 %v856_v10, 16  ;;  %v1253_v28 = vsel %vm1899_vm4, %v1248_v17, %v1252_v18  ;;  %v1714_v10 = vld [vmem:[%s1868_s27 + $0x28] sm:$0xf]  ;;  %v926_v17 = vshll.u32 %v858_v6, 16  ;;  %v937_v18 = vshrl.u32 %v860_v7, 16 }
  0x46   : > { %v897_v30 = vrot.slane %v895_v19, 4  ;;  %v900_v31 = vrot.slane %v898_v20, 5  ;;  %v1341_v44 = vunpack.c.l.b16 %v1253_v28  ;;  %v940_v19 = vshll.u32 %v860_v7, 16  ;;  %v1663_v28 = vld [vmem:[%s1868_s27 + $0x18] sm:$0xf] }
  0x47   : > { %v911_v32 = vrot.slane %v909_v21, 4  ;;  %v1283_v20 = vshrl.u32 %v1714_v10, 16  ;;  %v1286_v21 = vshll.u32 %v1714_v10, 16  ;;  %v1664_v52 = vor.u32 %v1747_v29, %v1663_v28  ;;  %v1718_v7 = vld [vmem:[%s1868_s27 + $0x38] sm:$0xf] }
  0x48   : > { %v901_v48 = vor.u32 %v900_v31, %v897_v30  ;;  %v1692_v30 = vld [vmem:[%s1856_s18 + $0x18] sm:$0xf]  ;;  %v925_v31 = vrot.slane %v923_v16, 4  ;;  %v942_v34 = vrot.slane %v940_v19, 5  ;;  %v954_v10 = vshll.u32 %v862_v3, 16 }
  0x49   : > { %v915_v50 = vor.u32 %v914_v33, %v911_v32  ;;  %v928_v32 = vrot.slane %v926_v17, 5  ;;  %v939_v33 = vrot.slane %v937_v18, 4  ;;  %v1285_v37 = vrot.slane %v1283_v20, 4 }
  0x4a   : > { %v902_v62 = vrot.slane %v901_v48, 4  ;;  %v1288_v38 = vrot.slane %v1286_v21, 5  ;;  %v1693_v53 = vor.u32 %v1751_v39, %v1692_v30  ;;  %v1311_v15 = vshrl.u32 %v1718_v7, 16  ;;  %v1667_v21 = vld [vmem:[%s1868_s27 + $0x28] sm:$0xf] }
  0x4b   : > { %v916_v0 = vrot.slane %v915_v50, 4  ;;  %v929_v48 = vor.u32 %v928_v32, %v925_v31  ;;  %v943_v50 = vor.u32 %v942_v34, %v939_v33  ;;  %v1314_v16 = vshll.u32 %v1718_v7, 16  ;;  %v863_v31 = vld [vmem:[%s1897_s9 + $0x34] sm:$0x1]  ;;  %v865_v32 = vld [vmem:[%s1897_s9 + $0x3c] sm:$0x1] }
  0x4c   : > { %v1289_v54 = vor.u32 %v1288_v38, %v1285_v37  ;;  %v956_v26 = vrot.slane %v954_v10, 5  ;;  %v970_v28 = vrot.slane %v968_v12, 5  ;;  %v1313_v33 = vrot.slane %v1311_v15, 4 }
  0x4d   : > { %v921_v9 = vsel %vm1899_vm4, %v916_v0, %v920_v1  ;;  %v1316_v34 = vrot.slane %v1314_v16, 5 }
  0x4e   : > { %v983_v25 = vunpack.c.l.b16 %v921_v9  ;;  %v951_v9 = vshrl.u32 %v862_v3, 16  ;;  %v1749_v3 = vld [vmem:[%s1868_s27 + $0x3c] sm:$0xf0] }
  0x53   : > { %1595 = vmatmul.msk.bf16.gmra.mxu1 %vm379_vm1, %v1591_v59  ;;  %v1660_v59 = vor.u32 %v1746_v42, %v1659_v41  ;;  %v1343_v41 = vunpack.c.l.b16 %v1281_v27  ;;  %v1715_v42 = vld [vmem:[%s1868_s27 + $0x2c] sm:$0x1]  ;;  %v967_v27 = vrot.slane %v965_v11, 4 }
  0x54   : > { %1600 = vmatmul.msk.bf16.gmra.mxu2 %vm379_vm1, %v633_v60  ;;  %1621 = vmatmul.msk.bf16.gmra.mxu3 %vm379_vm1, %v1617_v61  ;;  %v1689_v60 = vor.u32 %v1750_v47, %v1688_v45  ;;  %v1348_v61 = vpack.c.b16 %v1341_v44, %v1340_v43  ;;  %v1299_v43 = vrot.slane %v1297_v22, 4  ;;  %v1302_v44 = vrot.slane %v1300_v23, 5  ;;  %v1717_v47 = vld [vmem:[%s1868_s27 + $0x34] sm:$0x1]  ;;  %v1748_v22 = vld [vmem:[%s1868_s27 + $0x2c] sm:$0xf0] }
  0x55   : > { %1642 = vmatmul.msk.bf16.gmra.mxu0 %vm379_vm1, %v1638_v8  ;;  %v907_v8 = vsel %vm1899_vm4, %v902_v62, %v906_v63  ;;  %v1292_v55 = vshll.u32 %v1715_v42, 16  ;;  %v1306_v58 = vshll.u32 %v1717_v47, 16  ;;  %v948_v62 = vrot.slane %v946_v51, 5  ;;  %v1696_v23 = vld [vmem:[%s1856_s18 + $0x28] sm:$0xf] }
  0x56   : > { %v982_v24 = vunpack.c.l.b16 %v907_v8  ;;  %v1303_v57 = vor.u32 %v1302_v44, %v1299_v43  ;;  %v1290_v63 = vrot.slane %v1289_v54, 4  ;;  %v1720_v8 = vld [vmem:[%s1868_s27 + $0x40] sm:$0xf]  ;;  %v1668_v38 = vor.u32 %v1748_v22, %v1667_v21 }
  0x57   : > { %v1294_v0 = vrot.slane %v1292_v55, 5  ;;  %v1308_v2 = vrot.slane %v1306_v58, 5  ;;  %v1325_v17 = vshrl.u32 %v1720_v8, 16  ;;  %v1328_v18 = vshll.u32 %v1720_v8, 16 }
  0x58   : > { %v989_v45 = vpack.c.b16 %v983_v25, %v982_v24  ;;  %v1304_v1 = vrot.slane %v1303_v57, 4  ;;  %v1752_v24 = vld [vmem:[%s1856_s18 + $0x2c] sm:$0xf0]  ;;  %v953_v25 = vrot.slane %v951_v9, 4  ;;  %v960_v43 = vshll.u32 %v863_v31, 16 }
  0x59   : > { %v1295_v13 = vsel %vm1899_vm4, %v1290_v63, %v1294_v0  ;;  %v1327_v35 = vrot.slane %v1325_v17, 4  ;;  %v1330_v36 = vrot.slane %v1328_v18, 5  ;;  %v1697_v39 = vor.u32 %v1752_v24, %v1696_v23 }
  0x5a   : > { %v1309_v14 = vsel %vm1899_vm4, %v1304_v1, %v1308_v2  ;;  %v1344_v29 = vunpack.c.l.b16 %v1295_v13  ;;  %v957_v42 = vor.u32 %v956_v26, %v953_v25  ;;  %v971_v44 = vor.u32 %v970_v28, %v967_v27  ;;  %v1671_v2 = vld [vmem:[%s1868_s27 + $0x38] sm:$0xf] }
  0x5b   : > { %v1345_v30 = vunpack.c.l.b16 %v1309_v14  ;;  %v1672_v10 = vor.u32 %v1749_v3, %v1671_v2 }
  0x5c   : > { %v972_v54 = vrot.slane %v971_v44, 4 }
  0x5d   : > { %v1350_v47 = vpack.c.b16 %v1345_v30, %v1344_v29 }
  0x63   : > { %1644 = vmatmul.msk.bf16.vlgmr.msra.gmra.mxu1 %vm379_vm1, %v988_v56  ;;  %v1349_v56 = vpack.c.b16 %v1343_v41, %v1342_v40  ;;  %v1719_v40 = vld [vmem:[%s1868_s27 + $0x3c] sm:$0x1]  ;;  %v1721_v41 = vld [vmem:[%s1868_s27 + $0x44] sm:$0x1] }
  0x64   : > { %1673 = vmatmul.msk.bf16.vlgmr.msra.gmra.mxu2 %vm379_vm1, %v1660_v59  ;;  %1702 = vmatmul.msk.bf16.vlgmr.msra.gmra.mxu3 %vm379_vm1, %v1689_v60  ;;  %v930_v59 = vrot.slane %v929_v48, 4  ;;  %v934_v60 = vrot.slane %v932_v49, 5  ;;  %v1317_v48 = vor.u32 %v1316_v34, %v1313_v33  ;;  %v1320_v49 = vshll.u32 %v1719_v40, 16 }
  0x65   : > { %1723 = vmatmul.msk.bf16.vlgmr.msra.gmra.mxu0 %vm379_vm1, %v1348_v61  ;;  %v944_v61 = vrot.slane %v943_v50, 4  ;;  %v1331_v50 = vor.u32 %v1330_v36, %v1327_v35  ;;  %v1334_v51 = vshll.u32 %v1721_v41, 16 }
  0x66   : > { %v935_v5 = vsel %vm1899_vm4, %v930_v59, %v934_v60  ;;  %v1322_v57 = vrot.slane %v1320_v49, 5 }
  0x67   : > { %v949_v6 = vsel %vm1899_vm4, %v944_v61, %v948_v62  ;;  %v984_v19 = vunpack.c.l.b16 %v935_v5  ;;  %v1332_v58 = vrot.slane %v1331_v50, 4  ;;  %v1336_v59 = vrot.slane %v1334_v51, 5  ;;  %v1753_v5 = vld [vmem:[%s1856_s18 + $0x3c] sm:$0xf0] }
  0x68   : > { %v985_v20 = vunpack.c.l.b16 %v949_v6  ;;  %v1701_v11 = vor.u32 %v1753_v5, %v1700_v4  ;;  %v2124_v4 = vld [vmem:[%s2201_s5] ss:$0 sm:$0xff] }
  0x69   : > { %v1337_v63 = vsel %vm1899_vm4, %v1332_v58, %v1336_v59 }
  0x6a   : > { %v990_v37 = vpack.c.b16 %v985_v20, %v984_v19  ;;  %v1347_v7 = vunpack.c.l.b16 %v1337_v63 }
  0x73   : > { %1645 = vmatmul.msk.bf16.gmra.mxu1 %vm379_vm1, %v989_v45  ;;  %v974_v45 = vshll.u32 %v865_v32, 16 }
  0x74   : > { %1674 = vmatmul.msk.bf16.gmra.mxu2 %vm379_vm1, %v1664_v52  ;;  %1703 = vmatmul.msk.bf16.gmra.mxu3 %vm379_vm1, %v1693_v53  ;;  %v958_v52 = vrot.slane %v957_v42, 4  ;;  %v962_v53 = vrot.slane %v960_v43, 5 }
  0x75   : > { %1724 = vmatmul.msk.bf16.gmra.mxu0 %vm379_vm1, %v1349_v56  ;;  %v976_v55 = vrot.slane %v974_v45, 5  ;;  %v1318_v56 = vrot.slane %v1317_v48, 4 }
  0x76   : > { %v963_v60 = vsel %vm1899_vm4, %v958_v52, %v962_v53 }
  0x77   : > { %v977_v61 = vsel %vm1899_vm4, %v972_v54, %v976_v55  ;;  %v1323_v62 = vsel %vm1899_vm4, %v1318_v56, %v1322_v57  ;;  %v986_v0 = vunpack.c.l.b16 %v963_v60 }
  0x78   : > { %v987_v1 = vunpack.c.l.b16 %v977_v61  ;;  %v1346_v6 = vunpack.c.l.b16 %v1323_v62 }
  0x7a   : > { %v991_v8 = vpack.c.b16 %v987_v1, %v986_v0  ;;  %v1351_v12 = vpack.c.b16 %v1347_v7, %v1346_v6 }
  0x83   : > { %1646 = vmatmul.msk.bf16.gmra.mxu1 %vm379_vm1, %v990_v37 }
  0x84   : > { %1675 = vmatmul.msk.bf16.gmra.mxu2 %vm379_vm1, %v1668_v38  ;;  %1704 = vmatmul.msk.bf16.gmra.mxu3 %vm379_vm1, %v1697_v39 }
  0x85   : > { %1725 = vmatmul.msk.bf16.gmra.mxu0 %vm379_vm1, %v1350_v47 }
  0x90   : > { %v410_v9 = vpop.f32.mrf.mxu1 }
  0x92   : > { %v405_v13 = vpop.f32.mrf.mxu0 }
  0x93   : > { %1647 = vmatmul.msk.bf16.gmra.mxu1 %vm379_vm1, %v991_v8  ;;  %v2129_v8 = vld [vmem:[%s2202_s6] ss:$0 sm:$0xff] }
  0x94   : > { %1676 = vmatmul.msk.bf16.gmra.mxu2 %vm379_vm1, %v1672_v10  ;;  %1705 = vmatmul.msk.bf16.gmra.mxu3 %vm379_vm1, %v1701_v11 }
  0x95   : > { %1726 = vmatmul.msk.bf16.gmra.mxu0 %vm379_vm1, %v1351_v12 }
  0x97   : > { %v2073_v46 = vpop.f32.mrf.mxu2  ;;  %v2075_v14 = vpop.f32.mrf.mxu3 }
  0x98   : > { %v2077_v15 = vpop.f32.mrf.mxu1 }
  0x9a   : > { %v407_v16 = vpop.f32.mrf.mxu0 }
  0x9f   : > { %v2079_v17 = vpop.f32.mrf.mxu2  ;;  %v2081_v18 = vpop.f32.mrf.mxu3 }
  0xa0   : > { %v469_v19 = vpop.f32.mrf.mxu1 }
  0xa1   : > { %v470_v49 = vadd.f32 %v469_v19, %v405_v13 }
  0xa2   : > { %v822_v20 = vpop.f32.mrf.mxu0 }
  0xa7   : > { %v658_v21 = vpop.f32.mrf.mxu2  ;;  %v740_v22 = vpop.f32.mrf.mxu3 }
  0xa8   : > { %v471_v23 = vpop.f32.mrf.mxu1  ;;  %v678_v51 = vadd.f32 %v658_v21, %v470_v49 }
  0xa9   : > { %v472_v56 = vadd.f32 %v471_v23, %v407_v16 }
  0xaa   : > { %v824_v24 = vpop.f32.mrf.mxu0  ;;  %v760_v54 = vadd.f32 %v740_v22, %v678_v51 }
  0xac   : > { %v842_v59 = vadd.f32 %v822_v20, %v760_v54 }
  0xaf   : > { %v660_v25 = vpop.f32.mrf.mxu2  ;;  %v742_v26 = vpop.f32.mrf.mxu3 }
  0xb0   : > { %v474_v27 = vpop.f32.mrf.mxu1  ;;  %v679_v58 = vadd.f32 %v660_v25, %v472_v56 }
  0xb1   : > { %v475_v2 = vadd.f32 %v474_v27, %v410_v9 }
  0xb2   : > { %v2083_v28 = vpop.f32.mrf.mxu0  ;;  %v761_v63 = vadd.f32 %v742_v26, %v679_v58 }
  0xb4   : > { %v843_v10 = vadd.f32 %v824_v24, %v761_v63 }
  0xb7   : > { %v663_v29 = vpop.f32.mrf.mxu2  ;;  %v745_v30 = vpop.f32.mrf.mxu3 }
  0xb8   : > { %v476_v31 = vpop.f32.mrf.mxu1  ;;  %v680_v6 = vadd.f32 %v663_v29, %v475_v2 }
  0xb9   : > { %v477_v22 = vadd.f32 %v476_v31, %v2077_v15 }
  0xba   : > { %v2085_v32 = vpop.f32.mrf.mxu0  ;;  %v762_v16 = vadd.f32 %v745_v30, %v680_v6 }
  0xbc   : > { %v844_v30 = vadd.f32 %v2083_v28, %v762_v16 }
  0xbf   : > { %v665_v33 = vpop.f32.mrf.mxu2  ;;  %v2087_v34 = vpop.f32.mrf.mxu3 }
  0xc0   : > { %v2089_v35 = vpop.f32.mrf.mxu1  ;;  %v681_v24 = vadd.f32 %v665_v33, %v477_v22 }
  0xc1   : > { %v480_v33 = vadd.f32 %v2089_v35, %v2073_v46 }
  0xc2   : > { %v2091_v36 = vpop.f32.mrf.mxu0  ;;  %v763_v54 = vadd.f32 %v2087_v34, %v681_v24 }
  0xc4   : > { %v845_v63 = vadd.f32 %v2085_v32, %v763_v54 }
  0xc7   : > { %v2093_v37 = vpop.f32.mrf.mxu2  ;;  %v2095_v38 = vpop.f32.mrf.mxu3 }
  0xc8   : > { %v2097_v39 = vpop.f32.mrf.mxu1 }
  0xca   : > { %v2099_v40 = vpop.f32.mrf.mxu0 }
  0xcf   : > { %v2101_v41 = vpop.f32.mrf.mxu2  ;;  %v2103_v42 = vpop.f32.mrf.mxu3 }
  0xd0   : > { %v2105_v43 = vpop.f32.mrf.mxu1 }
  0xd2   : > { %v2107_v44 = vpop.f32.mrf.mxu0 }
  0xd7   : > { %v2109_v45 = vpop.f32.mrf.mxu2  ;;  %v2111_v47 = vpop.f32.mrf.mxu3 }
  0xd8   : > { %v2113_v48 = vpop.f32.mrf.mxu1 }
  0xda   : > { %v2115_v50 = vpop.f32.mrf.mxu0 }
  0xdf   : > { %v2117_v52 = vpop.f32.mrf.mxu2  ;;  %v2119_v53 = vpop.f32.mrf.mxu3 }
  0xe0   : > { %v1016_v55 = vpop.f32.mrf.mxu1 }
  0xe1   : > { %v1036_v60 = vadd.f32 %v1016_v55, %v842_v59 }
  0xe2   : > { %v1376_v57 = vpop.f32.mrf.mxu0 }
  0xe7   : > { %v1099_v61 = vpop.f32.mrf.mxu2  ;;  %v1182_v62 = vpop.f32.mrf.mxu3 }
  0xe8   : > { %v1119_v0 = vadd.f32 %v1099_v61, %v1036_v60  ;;  %v1018_v1 = vpop.f32.mrf.mxu1  ;;  %v682_v60 = vadd.f32 %v2093_v37, %v480_v33  ;;  %v482_v37 = vadd.f32 %v2097_v39, %v2079_v17 }
  0xe9   : > { %v1037_v12 = vadd.f32 %v1018_v1, %v843_v10 }
  0xea   : > { %v1202_v3 = vadd.f32 %v1182_v62, %v1119_v0  ;;  %v1378_v5 = vpop.f32.mrf.mxu0  ;;  %v683_v32 = vadd.f32 %v2101_v41, %v482_v37  ;;  %v485_v41 = vadd.f32 %v2105_v43, %v2075_v14 }
  0xec   : > { %v1396_v7 = vadd.f32 %v1376_v57, %v1202_v3  ;;  %v764_v3 = vadd.f32 %v2095_v38, %v682_v60 }
  0xee   : > { %v1408_v11 = vmul.f32 %v2124_v4, %v1396_v7 }
  0xef   : > { %v1101_v13 = vpop.f32.mrf.mxu2  ;;  %v1184_v9 = vpop.f32.mrf.mxu3 }
  0xf0   : > { %v1420_v19 = vadd.f32 %v2129_v8, %v1408_v11  ;;  %v1120_v20 = vadd.f32 %v1101_v13, %v1037_v12  ;;  %v1021_v21 = vpop.f32.mrf.mxu1  ;;  %v846_v12 = vadd.f32 %v2091_v36, %v764_v3 }
  0xf1   : > { %v1038_v15 = vadd.f32 %v1021_v21, %v844_v30 }
  0xf2   : > { %v1428_v23 = vmax.f32 %v1420_v19, 0.0  ;;  %v1203_v25 = vadd.f32 %v1184_v9, %v1120_v20  ;;  %v1381_v26 = vpop.f32.mrf.mxu0  ;;  %v765_v20 = vadd.f32 %v2103_v42, %v683_v32 }
  0xf4   : > { %v1436_v27 = vpack.c.bf16 %v1428_v23, %v1428_v23  ;;  %v1397_v29 = vadd.f32 %v1378_v5, %v1203_v25  ;;  %v684_v23 = vadd.f32 %v2109_v45, %v485_v41  ;;  %v847_v24 = vadd.f32 %v2099_v40, %v765_v20 }
  0xf5   : > { %v487_v45 = vadd.f32 %v2113_v48, %v2081_v18 }
  0xf6   : > { %1445 = vst.msk [vmem:[%s2138_s20] sm:$0xf] %vm1444_vm5, %v1436_v27  ;;  %v1409_v49 = vmul.f32 %v2124_v4, %v1397_v29 }
  0xf7   : > { %v1104_v31 = vpop.f32.mrf.mxu2  ;;  %v1187_v51 = vpop.f32.mrf.mxu3  ;;  %v685_v54 = vadd.f32 %v2117_v52, %v487_v45 }
  0xf8   : > { %v1421_v55 = vadd.f32 %v2129_v8, %v1409_v49  ;;  %v1121_v56 = vadd.f32 %v1104_v31, %v1038_v15  ;;  %v1023_v57 = vpop.f32.mrf.mxu1  ;;  %v766_v15 = vadd.f32 %v2111_v47, %v684_v23 }
  0xf9   : > { %v1039_v0 = vadd.f32 %v1023_v57, %v845_v63 }
  0xfa   : > { %v1429_v58 = vmax.f32 %v1421_v55, 0.0  ;;  %v1204_v59 = vadd.f32 %v1187_v51, %v1121_v56  ;;  %v1383_v28 = vpop.f32.mrf.mxu0  ;;  %v848_v57 = vadd.f32 %v2107_v44, %v766_v15 }
  0xfc   : > { %v1437_v61 = vpack.c.bf16 %v1429_v58, %v1429_v58  ;;  %v1398_v62 = vadd.f32 %v1381_v26, %v1204_v59 }
  0xfe   : > { %1446 = vst.msk [vmem:[%s2138_s20 + $0x4] sm:$0xf] %vm1444_vm5, %v1437_v61  ;;  %v1410_v34 = vmul.f32 %v2124_v4, %v1398_v62 }
  0xff   : > { %v1106_v1 = vpop.f32.mrf.mxu2  ;;  %v1189_v2 = vpop.f32.mrf.mxu3 }
 0x100   : > { %v1422_v46 = vadd.f32 %v2129_v8, %v1410_v34  ;;  %v1122_v35 = vadd.f32 %v1106_v1, %v1039_v0  ;;  %v1026_v5 = vpop.f32.mrf.mxu1 }
 0x101   : > { %v1040_v9 = vadd.f32 %v1026_v5, %v846_v12 }
 0x102   : > { %v1430_v6 = vmax.f32 %v1422_v46, 0.0  ;;  %v1205_v7 = vadd.f32 %v1189_v2, %v1122_v35  ;;  %v1386_v13 = vpop.f32.mrf.mxu0 }
 0x104   : > { %v1438_v10 = vpack.c.bf16 %v1430_v6, %v1430_v6  ;;  %v1399_v11 = vadd.f32 %v1383_v28, %v1205_v7  ;;  %v767_v28 = vadd.f32 %v2119_v53, %v685_v54 }
 0x106   : > { %1447 = vst.msk [vmem:[%s2138_s20 + $0x8] sm:$0xf] %vm1444_vm5, %v1438_v10  ;;  %v1411_v38 = vmul.f32 %v2124_v4, %v1399_v11  ;;  %v849_v34 = vadd.f32 %v2115_v50, %v767_v28 }
 0x107   : > { %v1109_v16 = vpop.f32.mrf.mxu2  ;;  %v1192_v19 = vpop.f32.mrf.mxu3 }
 0x108   : > { %v1423_v17 = vadd.f32 %v2129_v8, %v1411_v38  ;;  %v1123_v39 = vadd.f32 %v1109_v16, %v1040_v9  ;;  %v1028_v21 = vpop.f32.mrf.mxu1 }
 0x109   : > { %v1041_v42 = vadd.f32 %v1028_v21, %v847_v24 }
 0x10a   : > { %v1431_v22 = vmax.f32 %v1423_v17, 0.0  ;;  %v1206_v36 = vadd.f32 %v1192_v19, %v1123_v39  ;;  %v1388_v29 = vpop.f32.mrf.mxu0 }
 0x10c   : > { %v1439_v25 = vpack.c.bf16 %v1431_v22, %v1431_v22  ;;  %v1400_v26 = vadd.f32 %v1386_v13, %v1206_v36 }
 0x10e   : > { %1448 = vst.msk [vmem:[%s2138_s20 + $0xc] sm:$0xf] %vm1444_vm5, %v1439_v25  ;;  %v1412_v27 = vmul.f32 %v2124_v4, %v1400_v26 }
 0x10f   : > { %v1111_v30 = vpop.f32.mrf.mxu2  ;;  %v1194_v49 = vpop.f32.mrf.mxu3 }
 0x110   : > { %v1424_v14 = vadd.f32 %v2129_v8, %v1412_v27  ;;  %v1124_v43 = vadd.f32 %v1111_v30, %v1041_v42  ;;  %v1031_v31 = vpop.f32.mrf.mxu1 }
 0x111   : > { %v1042_v33 = vadd.f32 %v1031_v31, %v848_v57 }
 0x112   : > { %v1432_v51 = vmax.f32 %v1424_v14, 0.0  ;;  %v1207_v40 = vadd.f32 %v1194_v49, %v1124_v43  ;;  %v1391_v60 = vpop.f32.mrf.mxu0 }
 0x114   : > { %v1440_v55 = vpack.c.bf16 %v1432_v51, %v1432_v51  ;;  %v1401_v56 = vadd.f32 %v1388_v29, %v1207_v40 }
 0x116   : > { %1449 = vst.msk [vmem:[%s2138_s20 + $0x10] sm:$0xf] %vm1444_vm5, %v1440_v55  ;;  %v1413_v47 = vmul.f32 %v2124_v4, %v1401_v56 }
 0x117   : > { %v1114_v58 = vpop.f32.mrf.mxu2  ;;  %v1197_v59 = vpop.f32.mrf.mxu3 }
 0x118   : > { %v1425_v18 = vadd.f32 %v2129_v8, %v1413_v47  ;;  %v1125_v48 = vadd.f32 %v1114_v58, %v1042_v33  ;;  %v1033_v62 = vpop.f32.mrf.mxu1 }
 0x119   : > { %v1043_v1 = vadd.f32 %v1033_v62, %v849_v34 }
 0x11a   : > { %v1433_v61 = vmax.f32 %v1425_v18, 0.0  ;;  %v1208_v52 = vadd.f32 %v1197_v59, %v1125_v48  ;;  %v1393_v37 = vpop.f32.mrf.mxu0 }
 0x11c   : > { %v1441_v63 = vpack.c.bf16 %v1433_v61, %v1433_v61  ;;  %v1402_v44 = vadd.f32 %v1391_v60, %v1208_v52 }
 0x11e   : > { %1450 = vst.msk [vmem:[%s2138_s20 + $0x14] sm:$0xf] %vm1444_vm5, %v1441_v63  ;;  %v1414_v0 = vmul.f32 %v2124_v4, %v1402_v44 }
 0x11f   : > { %v1116_v2 = vpop.f32.mrf.mxu2  ;;  %v1199_v46 = vpop.f32.mrf.mxu3 }
 0x120   : > { %v1426_v53 = vadd.f32 %v2129_v8, %v1414_v0  ;;  %v1126_v3 = vadd.f32 %v1116_v2, %v1043_v1 }
 0x122   : > { %v1434_v35 = vmax.f32 %v1426_v53, 0.0  ;;  %v1209_v5 = vadd.f32 %v1199_v46, %v1126_v3 }
 0x124   : > { %v1442_v6 = vpack.c.bf16 %v1434_v35, %v1434_v35  ;;  %v1403_v7 = vadd.f32 %v1393_v37, %v1209_v5 }
 0x126   : > { %1451 = vst.msk [vmem:[%s2138_s20 + $0x18] sm:$0xf] %vm1444_vm5, %v1442_v6  ;;  %v1415_v50 = vmul.f32 %v2124_v4, %v1403_v7 }
 0x128   : > { %v1427_v32 = vadd.f32 %v2129_v8, %v1415_v50 }
 0x12a   : > { %v1435_v10 = vmax.f32 %v1427_v32, 0.0 }
 0x12c   : > { %v1443_v11 = vpack.c.bf16 %v1435_v10, %v1435_v10 }
 0x12e   : > { %1452 = vst.msk [vmem:[%s2138_s20 + $0x1c] sm:$0xf] %vm1444_vm5, %v1443_v11 }
 0x12f PF: > { %s17_s24 = sadd.s32 1, %s1774_s24  }
 0x130   : > { %p14_p4 = scmp.ge.s32.totalorder %s17_s24, 4  }
 0x132   :  { %16 = sbr.rel (!%p14_p4) target bundleno = 1 (0x1), region = 97 }

// kernel: basic_block_forward.3
= control target key start
LH: loop header
LB: loop body
LE: loop exit
PB: predicated region body
PF: predicated region fallthrough
CT: control target
= control target key end

     0   :  { %s2018_s27 = smov 0   ;;  %s2541_s0 = inlined_call_operand.vmem [shape: bf16[2,10,10,8], index: 0, kind: input, shape index: {}]   ;;  %s2542_s1 = inlined_call_operand.vmem [shape: bf16[9,8,8], index: 1, kind: input, shape index: {}]   ;;  %s2543_s2 = inlined_call_operand.vmem [shape: f32[1,8], index: 2, kind: input, shape index: {}]   ;;  %s2544_s3 = inlined_call_operand.vmem [shape: f32[1,8], index: 3, kind: input, shape index: {}]   ;;  %s2545_s4 = inlined_call_operand.vmem [shape: bf16[2,8,8,4], index: 4, kind: input, shape index: {}]   ;;  %s2546_s5 = inlined_call_operand.vmem [shape: bf16[4,8], index: 5, kind: input, shape index: {}]   ;;  %s2547_s6 = inlined_call_operand.vmem [shape: f32[1,8], index: 6, kind: input, shape index: {}]   ;;  %s2548_s7 = inlined_call_operand.vmem [shape: f32[1,8], index: 7, kind: input, shape index: {}]   ;;  %s2549_s8 = inlined_call_operand.vmem [shape: f32[2,8,8,8], index: 8, kind: output, shape index: {}]  }
   0x1 LB: > { %s1720_s28 = sadd.s32 4294967295, %s1971_s27   ;;  %p1724_p0 = scmp.ge.s32.totalorder %s1971_s27, 1  ;;  %s1971_s27 = sphi %s2018_s27, %s18_s27  }
   0x2   : > { %p272_p1 = scmp.lt.s32.totalorder %s1971_s27, 3 }
   0x4   : > { %p273_p2 = pnand %p1724_p0, %p272_p1 }
   0x5   : > { %p311_p3 = scmp.lt.s32.totalorder (!%p273_p2), %s1720_s28, 1 }
   0x6   : > { %276 = sbr.rel (%p273_p2) target bundleno = 333 (0x14d), region = 52 }
   0xb   : > { %v335_v0 = vld [vmem:[%s2542_s1] sm:$0xf]  ;;  %vm486_vm0 = vcmask 1043456   ;;  %v1730_v2 = vld [vmem:[%s2542_s1 + $0x4] sm:$0xf]  ;;  %s2555_s28 = smov (!%p311_p3, %s1720_s28), 1 }
   0xc   : > { %v552_v1 = vsel %vm486_vm0, %v335_v0, 0  ;;  %v488_v3 = vsel %vm486_vm0, %v1730_v2, 0  ;;  %v1763_v4 = vld [vmem:[%s2542_s1 + $0x8] sm:$0xf]  ;;  %vm344_vm1 = vsmask.f32 3328 }
   0xd   : > { %1951 = vmatpush.bf16.msra.mxu3 %v552_v1  ;;  %561 = vmatpush.bf16.msra.mxu1 %v552_v1  ;;  %v669_v5 = vsel %vm486_vm0, %v1763_v4, 0  ;;  %v1776_v6 = vld [vmem:[%s2542_s1 + $0xc] sm:$0xf]  ;;  %v1813_v7 = vld [vmem:[%s2542_s1 + $0x10] sm:$0xf]  ;;  %s1952_s17 = smul.u32 80, %s2555_s28 }
   0xe   : > { %1950 = vmatpush.bf16.msra.mxu2 %v488_v3  ;;  %497 = vmatpush.bf16.msra.mxu0 %v488_v3  ;;  %v752_v8 = vsel %vm486_vm0, %v1776_v6, 0  ;;  %v946_v9 = vsel %vm486_vm0, %v1813_v7, 0  ;;  %v1834_v10 = vld [vmem:[%s2542_s1 + $0x14] sm:$0xf]  ;;  %vm473_vm2 = vcmask 64512   ;;  %vm607_vm5 = vcmask 1042432  }
   0xf   : > { %v1068_v11 = vsel %vm486_vm0, %v1834_v10, 0  ;;  %s2056_s22 = scalar_lea.vmem %s2541_s0, %s1952_s17  ;;  %vm345_vm3 = vsmask.f32 7440  ;;  %vm608_vm6 = vcmask 1046532   ;;  %vm1572_vm8 = vcmask 1041408   ;;  %s1932_s11 = sshll.u32 %s2555_s28, 5 }
  0x10   : > { %v1745_v12 = vld [vmem:[%s2056_s22 + $0x20] sm:$0xf]  ;;  %v1936_v13 = vld [vmem:[%s2056_s22 + $0x24] sm:$0xf0]  ;;  %v2063_v17 = vld [vmem:[%s2056_s22 + $0x24] sm:$0x1]  ;;  %s2313_s14 = scalar_lea.vmem %s2545_s4, %s1932_s11 }
  0x11   : > { %761 = vmatpush.bf16.msrb.mxu3 %v752_v8  ;;  %1077 = vmatpush.bf16.msrb.mxu1 %v1068_v11  ;;  %v331_v14 = vld [vmem:[%s2056_s22 + $0x20] sm:$0xf]  ;;  %v1746_v15 = vor.u32 %v1936_v13, %v1745_v12  ;;  %v332_v16 = vld [vmem:[%s2056_s22 + $0x28] sm:$0xf]  ;;  %v2066_v18 = vld [vmem:[%s2056_s22 + $0x2c] sm:$0x1] }
  0x12   : > { %678 = vmatpush.bf16.msrb.mxu2 %v669_v5  ;;  %955 = vmatpush.bf16.msrb.mxu0 %v946_v9  ;;  %v404_v19 = vshrl.u32 %v331_v14, 16  ;;  %v407_v20 = vshll.u32 %v331_v14, 16  ;;  %v413_v21 = vshll.u32 %v2063_v17, 16  ;;  %v418_v22 = vshrl.u32 %v332_v16, 16  ;;  %v327_v23 = vld [vmem:[%s2056_s22] sm:$0xf]  ;;  %vm2084_vm4 = vmor %vm344_vm1, %vm345_vm3 }
  0x13   : > { %1753 = vmatmul.msk.bf16.vlgmr.msra.gmra.mxu3 %vm473_vm2, %v1746_v15  ;;  %v421_v24 = vshll.u32 %v332_v16, 16  ;;  %v427_v25 = vshll.u32 %v2066_v18, 16  ;;  %v328_v26 = vld [vmem:[%s2056_s22 + $0x8] sm:$0xf]  ;;  %v2074_v27 = vld [vmem:[%s2056_s22 + $0x4] sm:$0x1]  ;;  %vm2162_vm7 = vmor %vm607_vm5, %vm608_vm6 }
  0x14   : > { %v406_v28 = vrot.slane %v404_v19, 4  ;;  %v409_v29 = vrot.slane %v407_v20, 5  ;;  %v415_v30 = vrot.slane %v413_v21, 5  ;;  %v420_v31 = vrot.slane %v418_v22, 4  ;;  %v2077_v32 = vld [vmem:[%s2056_s22 + $0xc] sm:$0x1] }
  0x15   : > { %v423_v33 = vrot.slane %v421_v24, 5  ;;  %v429_v34 = vrot.slane %v427_v25, 5  ;;  %v348_v35 = vshrl.u32 %v327_v23, 16  ;;  %v351_v36 = vshll.u32 %v327_v23, 16  ;;  %v1737_v37 = vld [vmem:[%s2056_s22] sm:$0xf] }
  0x16   : > { %v410_v38 = vor.u32 %v409_v29, %v406_v28  ;;  %v357_v39 = vshll.u32 %v2074_v27, 16  ;;  %v362_v40 = vshrl.u32 %v328_v26, 16  ;;  %v365_v41 = vshll.u32 %v328_v26, 16  ;;  %v1934_v42 = vld [vmem:[%s2056_s22 + $0x4] sm:$0xf0]  ;;  %s1933_s23 = sshll.u32 %s2555_s28, 6 }
  0x17   : > { %v424_v44 = vor.u32 %v423_v33, %v420_v31  ;;  %v350_v45 = vrot.slane %v348_v35, 4  ;;  %v353_v46 = vrot.slane %v351_v36, 5  ;;  %v371_v47 = vshll.u32 %v2077_v32, 16  ;;  %v1749_v48 = vld [vmem:[%s2056_s22 + $0x30] sm:$0xf]  ;;  %s2470_s26 = scalar_lea.vmem %s2549_s8, %s1933_s23 }
  0x18   : > { %v411_v49 = vrot.slane %v410_v38, 4  ;;  %v364_v50 = vrot.slane %v362_v40, 4  ;;  %v367_v51 = vrot.slane %v365_v41, 5  ;;  %v1937_v52 = vld [vmem:[%s2056_s22 + $0x34] sm:$0xf0]  ;;  %v359_v55 = vrot.slane %v357_v39, 5 }
  0x19   : > { %v425_v53 = vrot.slane %v424_v44, 4  ;;  %v354_v54 = vor.u32 %v353_v46, %v350_v45  ;;  %v333_v56 = vld [vmem:[%s2056_s22 + $0x30] sm:$0xf]  ;;  %v373_v59 = vrot.slane %v371_v47, 5  ;;  %v1738_v60 = vor.u32 %v1934_v42, %v1737_v37  ;;  %v334_v61 = vld [vmem:[%s2056_s22 + $0x38] sm:$0xf] }
  0x1a   : > { %v416_v57 = vsel %vm2084_vm4, %v411_v49, %v415_v30  ;;  %v368_v58 = vor.u32 %v367_v51, %v364_v50  ;;  %v2096_v62 = vld [vmem:[%s2056_s22 + $0x34] sm:$0x1]  ;;  %v1750_v2 = vor.u32 %v1937_v52, %v1749_v48  ;;  %v2102_v5 = vld [vmem:[%s2056_s22 + $0x3c] sm:$0x1]  ;;  %v432_v6 = vshrl.u32 %v333_v56, 16 }
  0x1b   : > { %v430_v63 = vsel %vm2084_vm4, %v425_v53, %v429_v34  ;;  %v465_v0 = vunpack.c.l.b16 %v416_v57  ;;  %v355_v1 = vrot.slane %v354_v54, 4  ;;  %1751 = vmatmul.msk.bf16.vlgmr.msra.gmra.mxu1 %vm473_vm2, %v1738_v60  ;;  %v435_v7 = vshll.u32 %v333_v56, 16  ;;  %v329_v12 = vld [vmem:[%s2056_s22 + $0x10] sm:$0xf]  ;;  %v330_v19 = vld [vmem:[%s2056_s22 + $0x18] sm:$0xf] }
  0x1c   : > { %v466_v3 = vunpack.c.l.b16 %v430_v63  ;;  %v369_v4 = vrot.slane %v368_v58, 4  ;;  %v441_v9 = vshll.u32 %v2096_v62, 16  ;;  %v446_v10 = vshrl.u32 %v334_v61, 16  ;;  %v2112_v20 = vld [vmem:[%s2056_s22 + $0x14] sm:$0x1] }
  0x1d   : > { %v360_v8 = vsel %vm2084_vm4, %v355_v1, %v359_v55  ;;  %v449_v11 = vshll.u32 %v334_v61, 16  ;;  %v434_v16 = vrot.slane %v432_v6, 4  ;;  %v437_v22 = vrot.slane %v435_v7, 5  ;;  %v2117_v33 = vld [vmem:[%s2056_s22 + $0x1c] sm:$0x1] }
  0x1e   : > { %v471_v13 = vpack.c.b16 %v466_v3, %v465_v0  ;;  %v374_v14 = vsel %vm2084_vm4, %v369_v4, %v373_v59  ;;  %v461_v15 = vunpack.c.l.b16 %v360_v8  ;;  %v443_v23 = vrot.slane %v441_v9, 5  ;;  %v1741_v44 = vld [vmem:[%s2056_s22 + $0x10] sm:$0xf]  ;;  %v1935_v49 = vld [vmem:[%s2056_s22 + $0x14] sm:$0xf0] }
  0x1f   : > { %v462_v21 = vunpack.c.l.b16 %v374_v14  ;;  %v448_v24 = vrot.slane %v446_v10, 4  ;;  %v451_v25 = vrot.slane %v449_v11, 5  ;;  %v455_v26 = vshll.u32 %v2102_v5, 16  ;;  %v1847_v52 = vld [vmem:[%s2542_s1 + $0x18] sm:$0xf] }
  0x20   : > { %1733 = vmatmul.msk.bf16.vlgmr.msra.gmra.mxu2 %vm473_vm2, %v471_v13  ;;  %v376_v28 = vshrl.u32 %v329_v12, 16  ;;  %v379_v29 = vshll.u32 %v329_v12, 16  ;;  %v438_v31 = vor.u32 %v437_v22, %v434_v16  ;;  %v385_v34 = vshll.u32 %v2112_v20, 16  ;;  %v1797_v53 = vld [vmem:[%s2056_s22 + $0x8] sm:$0xf] }
  0x21   : > { %v469_v30 = vpack.c.b16 %v462_v21, %v461_v15  ;;  %v390_v35 = vshrl.u32 %v330_v19, 16  ;;  %v452_v36 = vor.u32 %v451_v25, %v448_v24  ;;  %v457_v37 = vrot.slane %v455_v26, 5  ;;  %v2135_v57 = vld [vmem:[%s2056_s22 + $0x8] sm:$0xf]  ;;  %v1938_v58 = vld [vmem:[%s2056_s22 + $0xc] sm:$0xf0] }
  0x22   : > { %v378_v38 = vrot.slane %v376_v28, 4  ;;  %v381_v39 = vrot.slane %v379_v29, 5  ;;  %v439_v40 = vrot.slane %v438_v31, 4  ;;  %v393_v42 = vshll.u32 %v330_v19, 16  ;;  %v1799_v3 = vld [vmem:[%s2056_s22 + $0x10] sm:$0xf] }
  0x23   : > { %1731 = vmatmul.msk.bf16.vlgmr.msra.gmra.mxu0 %vm473_vm2, %v469_v30  ;;  %1754 = vmatmul.msk.bf16.gmra.mxu3 %vm473_vm2, %v1750_v2  ;;  %v392_v41 = vrot.slane %v390_v35, 4  ;;  %v453_v45 = vrot.slane %v452_v36, 4  ;;  %v387_v47 = vrot.slane %v385_v34, 5  ;;  %v399_v48 = vshll.u32 %v2117_v33, 16  ;;  %v583_v2 = vld [vmem:[%s2056_s22] sm:$0xe] }
  0x24   : > { %v382_v46 = vor.u32 %v381_v39, %v378_v38  ;;  %v444_v50 = vsel %vm2084_vm4, %v439_v40, %v443_v23  ;;  %v395_v51 = vrot.slane %v393_v42, 5  ;;  %v612_v54 = vrot.slane %v2074_v27, 5  ;;  %v584_v9 = vld [vmem:[%s2056_s22 + $0x8] sm:$0xe]  ;;  %v1798_v10 = vld [vmem:[%s2056_s22 + $0xc] sm:$0x1] }
  0x25   : > { %v458_v55 = vsel %vm2084_vm4, %v453_v45, %v457_v37  ;;  %v467_v59 = vunpack.c.l.b16 %v444_v50  ;;  %v401_v61 = vrot.slane %v399_v48, 5  ;;  %v1742_v63 = vor.u32 %v1935_v49, %v1741_v44  ;;  %v1884_v14 = vld [vmem:[%s2542_s1 + $0x1c] sm:$0xf]  ;;  %v1800_v16 = vld [vmem:[%s2056_s22 + $0x14] sm:$0x1] }
  0x26   : > { %v383_v56 = vrot.slane %v382_v46, 4  ;;  %v396_v60 = vor.u32 %v395_v51, %v392_v41  ;;  %v468_v0 = vunpack.c.l.b16 %v458_v55  ;;  %v1151_v27 = vsel %vm486_vm0, %v1847_v52, 0  ;;  %v1818_v25 = vld [vmem:[%s2056_s22 + $0x8] sm:$0xe]  ;;  %v1819_v26 = vld [vmem:[%s2056_s22 + $0x10] sm:$0xe] }
  0x27   : > { %v808_v4 = vshrl.u32 %v1797_v53, 16  ;;  %v616_v6 = vrot.slane %v2077_v32, 5  ;;  %v1780_v8 = vor.u32 %v1938_v58, %v2135_v57  ;;  %1160 = vmatpush.bf16.msra.mxu2 %v1151_v27  ;;  %v811_v13 = vshll.u32 %v1797_v53, 16  ;;  %v1905_v34 = vld [vmem:[%s2542_s1 + $0x20] sm:$0xf] }
  0x28   : > { %v388_v1 = vsel %vm2084_vm4, %v383_v56, %v387_v47  ;;  %v397_v7 = vrot.slane %v396_v60, 4  ;;  %v1755_v32 = vrot.slane %v583_v2, 9  ;;  %v822_v19 = vshrl.u32 %v1799_v3, 16  ;;  %v1538_v47 = vld [vmem:[%s2546_s5] sm:$0x3] }
  0x29   : > { %v463_v11 = vunpack.c.l.b16 %v388_v1  ;;  %v810_v12 = vrot.slane %v808_v4, 4  ;;  %v472_v21 = vpack.c.b16 %v468_v0, %v467_v59  ;;  %v813_v23 = vrot.slane %v811_v13, 5  ;;  %v1801_v58 = vld [vmem:[%s2056_s22 + $0x18] sm:$0xf]  ;;  %v1939_v1 = vld [vmem:[%s2056_s22 + $0x1c] sm:$0xf0] }
  0x2a   : > { %v402_v15 = vsel %vm2084_vm4, %v397_v7, %v401_v61  ;;  %v825_v24 = vshll.u32 %v1799_v3, 16  ;;  %v1756_v28 = vrot.slane %v584_v9, 9  ;;  %v817_v29 = vshll.u32 %v1798_v10, 16  ;;  %v1783_v0 = vld [vmem:[%s2056_s22 + $0x18] sm:$0xf] }
  0x2b   : > { %v464_v22 = vunpack.c.l.b16 %v402_v15  ;;  %1752 = vmatmul.msk.bf16.gmra.mxu1 %vm473_vm2, %v1742_v63  ;;  %v824_v30 = vrot.slane %v822_v19, 4  ;;  %v1345_v31 = vsel %vm486_vm0, %v1884_v14, 0  ;;  %v814_v36 = vor.u32 %v813_v23, %v810_v12  ;;  %v585_v4 = vld [vmem:[%s2056_s22 + $0x10] sm:$0xe]  ;;  %v1820_v13 = vld [vmem:[%s2056_s22 + $0x18] sm:$0xe] }
  0x2c   : > { %v827_v37 = vrot.slane %v825_v24, 5  ;;  %v831_v38 = vshll.u32 %v1800_v16, 16  ;;  %1354 = vmatpush.bf16.msra.mxu3 %v1345_v31  ;;  %v1826_v40 = vrot.slane %v1818_v25, 9  ;;  %v1011_v41 = vrot.slane %v1798_v10, 5  ;;  %v587_v10 = vld [vmem:[%s2056_s22 + $0x20] sm:$0xe] }
  0x2d   : > { %v470_v35 = vpack.c.b16 %v464_v22, %v463_v11  ;;  %v1827_v42 = vrot.slane %v1819_v26, 9  ;;  %v1015_v44 = vrot.slane %v1800_v16, 5  ;;  %v1467_v46 = vsel %vm486_vm0, %v1905_v34, 0  ;;  %v588_v14 = vld [vmem:[%s2056_s22 + $0x28] sm:$0xe] }
  0x2e   : > { %v828_v45 = vor.u32 %v827_v37, %v824_v30  ;;  %v1012_v48 = vsel %vm2162_vm7, %v1826_v40, %v1011_v41  ;;  %1476 = vmatpush.bf16.msra.mxu0 %v1467_v46  ;;  %v613_v50 = vsel %vm2162_vm7, %v1755_v32, %v612_v54  ;;  %v617_v51 = vsel %vm2162_vm7, %v1756_v28, %v616_v6  ;;  %v1803_v54 = vld [vmem:[%s2056_s22 + $0x20] sm:$0xf]  ;;  %v586_v16 = vld [vmem:[%s2056_s22 + $0x18] sm:$0xe]  ;;  %v1802_v23 = vld [vmem:[%s2056_s22 + $0x1c] sm:$0x1] }
  0x2f   : > { %v1016_v49 = vsel %vm2162_vm7, %v1827_v42, %v1015_v44  ;;  %v819_v52 = vrot.slane %v817_v29, 5  ;;  %v815_v53 = vrot.slane %v814_v36, 4  ;;  %v833_v56 = vrot.slane %v831_v38, 5  ;;  %v1821_v22 = vld [vmem:[%s2056_s22 + $0x20] sm:$0xe] }
  0x30   : > { %1734 = vmatmul.msk.bf16.gmra.mxu2 %vm473_vm2, %v472_v21  ;;  %v829_v55 = vrot.slane %v828_v45, 4  ;;  %v1574_v57 = vsel %vm1572_vm8, %v1538_v47, 0  ;;  %v1043_v59 = vunpack.c.l.b16 %v1012_v48  ;;  %v1044_v60 = vunpack.c.l.b16 %v1016_v49  ;;  %v1804_v29 = vld [vmem:[%s2056_s22 + $0x24] sm:$0x1]  ;;  %v1895_v43 = vld [vmem:[%s2056_s22 + $0x40] sm:$0xe] }
  0x31   : > { %1583 = vmatpush.bf16.msra.mxu1 %v1574_v57  ;;  %v644_v61 = vunpack.c.l.b16 %v613_v50  ;;  %v645_v63 = vunpack.c.l.b16 %v617_v51  ;;  %v836_v2 = vshrl.u32 %v1801_v58, 16  ;;  %v820_v27 = vsel %vm2084_vm4, %v815_v53, %v819_v52  ;;  %v1805_v52 = vld [vmem:[%s2056_s22 + $0x28] sm:$0xf] }
  0x32   : > { %v834_v3 = vsel %vm2084_vm4, %v829_v55, %v833_v56  ;;  %v839_v6 = vshll.u32 %v1801_v58, 16  ;;  %v850_v7 = vshrl.u32 %v1803_v54, 16  ;;  %v853_v9 = vshll.u32 %v1803_v54, 16  ;;  %v1807_v58 = vld [vmem:[%s2056_s22 + $0x30] sm:$0xf] }
  0x33   : > { %1732 = vmatmul.msk.bf16.gmra.mxu0 %vm473_vm2, %v470_v35  ;;  %1793 = vmatmul.msk.bf16.vlgmr.msrb.gmra.mxu3 %vm473_vm2, %v1780_v8  ;;  %v1051_v8 = vpack.c.b16 %v1044_v60, %v1043_v59  ;;  %v652_v11 = vpack.c.b16 %v645_v63, %v644_v61  ;;  %v1784_v12 = vor.u32 %v1939_v1, %v1783_v0  ;;  %v921_v15 = vunpack.c.l.b16 %v820_v27  ;;  %v589_v63 = vld [vmem:[%s2056_s22 + $0x30] sm:$0xe] }
  0x34   : > { %v922_v32 = vunpack.c.l.b16 %v834_v3  ;;  %v1757_v19 = vrot.slane %v585_v4, 9  ;;  %v838_v21 = vrot.slane %v836_v2, 4  ;;  %v841_v24 = vrot.slane %v839_v6, 5  ;;  %v590_v2 = vld [vmem:[%s2056_s22 + $0x38] sm:$0xe] }
  0x35   : > { %v852_v25 = vrot.slane %v850_v7, 4  ;;  %v1759_v26 = vrot.slane %v587_v10, 9  ;;  %v628_v28 = vrot.slane %v2063_v17, 5  ;;  %v855_v30 = vrot.slane %v853_v9, 5 }
  0x36   : > { %v1828_v31 = vrot.slane %v1820_v13, 9  ;;  %v1019_v34 = vrot.slane %v1802_v23, 5  ;;  %v1760_v35 = vrot.slane %v588_v14, 9  ;;  %v1829_v36 = vrot.slane %v1821_v22, 9 }
  0x37   : > { %v1023_v37 = vrot.slane %v1804_v29, 5  ;;  %v629_v38 = vsel %vm2162_vm7, %v1759_v26, %v628_v28  ;;  %v632_v40 = vrot.slane %v2066_v18, 5  ;;  %v620_v41 = vrot.slane %v2112_v20, 5  ;;  %v1808_v28 = vld [vmem:[%s2056_s22 + $0x34] sm:$0x1] }
  0x38   : > { %v1758_v42 = vrot.slane %v586_v16, 9  ;;  %v624_v17 = vrot.slane %v2117_v33, 5  ;;  %v648_v44 = vunpack.c.l.b16 %v629_v38  ;;  %v929_v45 = vpack.c.b16 %v922_v32, %v921_v15  ;;  %v1806_v15 = vld [vmem:[%s2056_s22 + $0x2c] sm:$0x1]  ;;  %v1822_v16 = vld [vmem:[%s2056_s22 + $0x28] sm:$0xe] }
  0x39   : > { %v845_v46 = vshll.u32 %v1802_v23, 16  ;;  %v859_v47 = vshll.u32 %v1804_v29, 16  ;;  %v633_v48 = vsel %vm2162_vm7, %v1760_v35, %v632_v40  ;;  %v842_v49 = vor.u32 %v841_v24, %v838_v21  ;;  %v1823_v23 = vld [vmem:[%s2056_s22 + $0x30] sm:$0xe] }
  0x3a   : > { %v856_v50 = vor.u32 %v855_v30, %v852_v25  ;;  %v649_v51 = vunpack.c.l.b16 %v633_v48  ;;  %v1020_v18 = vsel %vm2162_vm7, %v1828_v31, %v1019_v34  ;;  %v1024_v20 = vsel %vm2162_vm7, %v1829_v36, %v1023_v37  ;;  %v1787_v30 = vld [vmem:[%s2056_s22 + $0x28] sm:$0xf]  ;;  %v1940_v31 = vld [vmem:[%s2056_s22 + $0x2c] sm:$0xf0] }
  0x3b   : > { %1835 = vmatmul.msk.bf16.vlgmr.msrb.gmra.mxu1 %vm473_vm2, %v1051_v8  ;;  %v621_v53 = vsel %vm2162_vm7, %v1757_v19, %v620_v41  ;;  %v625_v55 = vsel %vm2162_vm7, %v1758_v42, %v624_v17  ;;  %v847_v56 = vrot.slane %v845_v46, 5  ;;  %v861_v57 = vrot.slane %v859_v47, 5 }
  0x3c   : > { %v2211_v33 = vpack.c.b16 %v649_v51, %v648_v44  ;;  %v843_v59 = vrot.slane %v842_v49, 4  ;;  %v857_v60 = vrot.slane %v856_v50, 4  ;;  %v1045_v54 = vunpack.c.l.b16 %v1020_v18  ;;  %v1809_v18 = vld [vmem:[%s2056_s22 + $0x38] sm:$0xf] }
  0x3d   : > { %v1046_v61 = vunpack.c.l.b16 %v1024_v20  ;;  %v864_v0 = vshrl.u32 %v1805_v52, 16  ;;  %v867_v1 = vshll.u32 %v1805_v52, 16  ;;  %v1761_v27 = vrot.slane %v589_v63, 9  ;;  %v1811_v20 = vld [vmem:[%s2056_s22 + $0x40] sm:$0xf] }
  0x3e   : > { %v878_v3 = vshrl.u32 %v1807_v58, 16  ;;  %v881_v4 = vshll.u32 %v1807_v58, 16  ;;  %v636_v6 = vrot.slane %v2096_v62, 5  ;;  %v1762_v7 = vrot.slane %v590_v2, 9  ;;  %v1870_v58 = vld [vmem:[%s2056_s22 + $0x18] sm:$0xf] }
  0x3f   : > { %v646_v8 = vunpack.c.l.b16 %v621_v53  ;;  %v647_v9 = vunpack.c.l.b16 %v625_v55  ;;  %v640_v10 = vrot.slane %v2102_v5, 5  ;;  %v1052_v13 = vpack.c.b16 %v1046_v61, %v1045_v54  ;;  %v1868_v55 = vld [vmem:[%s2056_s22 + $0x10] sm:$0xf]  ;;  %v1824_v2 = vld [vmem:[%s2056_s22 + $0x38] sm:$0xe] }
  0x40   : > { %1764 = vmatmul.msk.bf16.vlgmr.msrb.gmra.mxu2 %vm473_vm2, %v652_v11  ;;  %v848_v11 = vsel %vm2084_vm4, %v843_v59, %v847_v56  ;;  %v637_v14 = vsel %vm2162_vm7, %v1761_v27, %v636_v6  ;;  %v866_v62 = vrot.slane %v864_v0, 4  ;;  %v869_v32 = vrot.slane %v867_v1, 5  ;;  %v1825_v27 = vld [vmem:[%s2056_s22 + $0x40] sm:$0xe] }
  0x41   : > { %v641_v5 = vsel %vm2162_vm7, %v1762_v7, %v640_v10  ;;  %v650_v19 = vunpack.c.l.b16 %v637_v14  ;;  %v880_v21 = vrot.slane %v878_v3, 4  ;;  %v883_v22 = vrot.slane %v881_v4, 5  ;;  %v1812_v10 = vld [vmem:[%s2056_s22 + $0x44] sm:$0x1] }
  0x42   : > { %v651_v24 = vunpack.c.l.b16 %v641_v5  ;;  %v923_v25 = vunpack.c.l.b16 %v848_v11  ;;  %v653_v29 = vpack.c.b16 %v647_v9, %v646_v8  ;;  %v873_v34 = vshll.u32 %v1806_v15, 16  ;;  %v1791_v8 = vld [vmem:[%s2056_s22 + $0x38] sm:$0xf]  ;;  %v1810_v9 = vld [vmem:[%s2056_s22 + $0x3c] sm:$0x1] }
  0x43   : > { %1814 = vmatmul.msk.bf16.vlgmr.msrb.gmra.mxu0 %vm473_vm2, %v929_v45  ;;  %1794 = vmatmul.msk.bf16.gmra.mxu3 %vm473_vm2, %v1784_v12  ;;  %v862_v12 = vsel %vm2084_vm4, %v857_v60, %v861_v57  ;;  %v1830_v35 = vrot.slane %v1822_v16, 9  ;;  %v870_v37 = vor.u32 %v869_v32, %v866_v62  ;;  %v1027_v38 = vrot.slane %v1806_v15, 5  ;;  %v1941_v15 = vld [vmem:[%s2056_s22 + $0x3c] sm:$0xf0] }
  0x44   : > { %v924_v26 = vunpack.c.l.b16 %v862_v12  ;;  %v2240_v36 = vpack.c.b16 %v651_v24, %v650_v19  ;;  %v1831_v40 = vrot.slane %v1823_v23, 9  ;;  %v1031_v41 = vrot.slane %v1808_v28, 5  ;;  %v2265_v19 = vld [vmem:[%s2056_s22 + $0x14] sm:$0x1] }
  0x45   : > { %v884_v42 = vor.u32 %v883_v22, %v880_v21  ;;  %v887_v17 = vshll.u32 %v1808_v28, 16  ;;  %v1788_v45 = vor.u32 %v1940_v31, %v1787_v30  ;;  %v871_v46 = vrot.slane %v870_v37, 4 }
  0x46   : > { %v930_v44 = vpack.c.b16 %v924_v26, %v923_v25  ;;  %v875_v47 = vrot.slane %v873_v34, 5  ;;  %v1028_v48 = vsel %vm2162_vm7, %v1830_v35, %v1027_v38  ;;  %v1032_v49 = vsel %vm2162_vm7, %v1831_v40, %v1031_v41  ;;  %v2268_v25 = vld [vmem:[%s2056_s22 + $0x1c] sm:$0x1] }
  0x47   : > { %v885_v50 = vrot.slane %v884_v42, 4  ;;  %v889_v51 = vrot.slane %v887_v17, 5  ;;  %v1047_v52 = vunpack.c.l.b16 %v1028_v48  ;;  %v1048_v53 = vunpack.c.l.b16 %v1032_v49  ;;  %v1872_v49 = vld [vmem:[%s2056_s22 + $0x20] sm:$0xf] }
  0x48   : > { %v876_v56 = vsel %vm2084_vm4, %v871_v46, %v875_v47  ;;  %v892_v57 = vshrl.u32 %v1809_v18, 16  ;;  %v895_v60 = vshll.u32 %v1809_v18, 16  ;;  %v906_v54 = vshrl.u32 %v1811_v20, 16 }
  0x49   : > { %v890_v59 = vsel %vm2084_vm4, %v885_v50, %v889_v51  ;;  %v909_v61 = vshll.u32 %v1811_v20, 16  ;;  %v1207_v63 = vshrl.u32 %v1868_v55, 16  ;;  %v1210_v0 = vshll.u32 %v1868_v55, 16  ;;  %v1874_v50 = vld [vmem:[%s2056_s22 + $0x28] sm:$0xf] }
  0x4a   : > { %v1053_v1 = vpack.c.b16 %v1048_v53, %v1047_v52  ;;  %v1221_v3 = vshrl.u32 %v1870_v58, 16  ;;  %v1224_v4 = vshll.u32 %v1870_v58, 16  ;;  %v925_v6 = vunpack.c.l.b16 %v876_v56 }
  0x4b   : > { %1836 = vmatmul.msk.bf16.gmra.mxu1 %vm473_vm2, %v1052_v13  ;;  %v926_v7 = vunpack.c.l.b16 %v890_v59  ;;  %v894_v11 = vrot.slane %v892_v57, 4  ;;  %v897_v12 = vrot.slane %v895_v60, 5  ;;  %v908_v13 = vrot.slane %v906_v54, 4 }
  0x4c   : > { %v911_v14 = vrot.slane %v909_v61, 5  ;;  %v1832_v62 = vrot.slane %v1824_v2, 9  ;;  %v1035_v32 = vrot.slane %v1810_v9, 5  ;;  %v1833_v16 = vrot.slane %v1825_v27, 9 }
  0x4d   : > { %v1039_v5 = vrot.slane %v1812_v10, 5  ;;  %v1209_v21 = vrot.slane %v1207_v63, 4  ;;  %v1212_v22 = vrot.slane %v1210_v0, 5  ;;  %v1223_v23 = vrot.slane %v1221_v3, 4 }
  0x4e   : > { %v1226_v24 = vrot.slane %v1224_v4, 5  ;;  %v931_v26 = vpack.c.b16 %v926_v7, %v925_v6  ;;  %v1792_v28 = vor.u32 %v1941_v15, %v1791_v8  ;;  %v915_v30 = vshll.u32 %v1812_v10, 16  ;;  %v2291_v6 = vld [vmem:[%s2056_s22 + $0x24] sm:$0x1]  ;;  %v2294_v7 = vld [vmem:[%s2056_s22 + $0x2c] sm:$0x1] }
  0x4f   : > { %v898_v31 = vor.u32 %v897_v12, %v894_v11  ;;  %v912_v34 = vor.u32 %v911_v14, %v908_v13  ;;  %v1036_v35 = vsel %vm2162_vm7, %v1832_v62, %v1035_v32  ;;  %v1216_v37 = vshll.u32 %v2265_v19, 16  ;;  %v1889_v8 = vld [vmem:[%s2056_s22 + $0x10] sm:$0xe] }
  0x50   : > { %1765 = vmatmul.msk.bf16.gmra.mxu2 %vm473_vm2, %v653_v29  ;;  %v901_v29 = vshll.u32 %v1810_v9, 16  ;;  %v1040_v38 = vsel %vm2162_vm7, %v1833_v16, %v1039_v5  ;;  %v1213_v40 = vor.u32 %v1212_v22, %v1209_v21  ;;  %v1227_v41 = vor.u32 %v1226_v24, %v1223_v23  ;;  %v1890_v9 = vld [vmem:[%s2056_s22 + $0x18] sm:$0xe] }
  0x51   : > { %v1230_v42 = vshll.u32 %v2268_v25, 16  ;;  %v913_v46 = vrot.slane %v912_v34, 4  ;;  %v1049_v47 = vunpack.c.l.b16 %v1036_v35  ;;  %v1050_v48 = vunpack.c.l.b16 %v1040_v38  ;;  %v1850_v38 = vld [vmem:[%s2056_s22 + $0x10] sm:$0xf] }
  0x52   : > { %v903_v17 = vrot.slane %v901_v29, 5  ;;  %v1218_v51 = vrot.slane %v1216_v37, 5  ;;  %v1228_v18 = vrot.slane %v1227_v41, 4  ;;  %v1235_v52 = vshrl.u32 %v1872_v49, 16  ;;  %v1946_v37 = vld [vmem:[%s2313_s14] sm:$0xff] }
  0x53   : > { %1815 = vmatmul.msk.bf16.gmra.mxu0 %vm473_vm2, %v930_v44  ;;  %1795 = vmatmul.msk.bf16.gmra.mxu3 %vm473_vm2, %v1788_v45  ;;  %v917_v44 = vrot.slane %v915_v30, 5  ;;  %v899_v45 = vrot.slane %v898_v31, 4  ;;  %v1232_v20 = vrot.slane %v1230_v42, 5  ;;  %v1238_v53 = vshll.u32 %v1872_v49, 16 }
  0x54   : > { %v1249_v55 = vshrl.u32 %v1874_v50, 16  ;;  %v1252_v56 = vshll.u32 %v1874_v50, 16  ;;  %v1054_v59 = vpack.c.b16 %v1050_v48, %v1049_v47  ;;  %v1237_v61 = vrot.slane %v1235_v52, 4  ;;  %v2328_v50 = vld [vmem:[%s2056_s22 + $0x34] sm:$0x1] }
  0x55   : > { %v904_v57 = vsel %vm2084_vm4, %v899_v45, %v903_v17  ;;  %v918_v58 = vsel %vm2084_vm4, %v913_v46, %v917_v44  ;;  %v1233_v54 = vsel %vm2084_vm4, %v1228_v18, %v1232_v20  ;;  %v1240_v63 = vrot.slane %v1238_v53, 5  ;;  %v1891_v20 = vld [vmem:[%s2056_s22 + $0x20] sm:$0xe]  ;;  %v1892_v52 = vld [vmem:[%s2056_s22 + $0x28] sm:$0xe] }
  0x56   : > { %v1251_v0 = vrot.slane %v1249_v55, 4  ;;  %v927_v2 = vunpack.c.l.b16 %v904_v57  ;;  %v928_v27 = vunpack.c.l.b16 %v918_v58  ;;  %v1321_v4 = vunpack.c.l.b16 %v1233_v54 }
  0x57   : > { %v1241_v10 = vor.u32 %v1240_v63, %v1237_v61  ;;  %v1244_v11 = vshll.u32 %v2291_v6, 16  ;;  %v1258_v13 = vshll.u32 %v2294_v7, 16  ;;  %v1897_v62 = vrot.slane %v1889_v8, 9 }
  0x58   : > { %v932_v14 = vpack.c.b16 %v928_v27, %v927_v2  ;;  %v1410_v32 = vrot.slane %v2265_v19, 5  ;;  %v1898_v16 = vrot.slane %v1890_v9, 9  ;;  %v1414_v5 = vrot.slane %v2268_v25, 5  ;;  %v1880_v2 = vld [vmem:[%s2056_s22 + $0x40] sm:$0xf] }
  0x59   : > { %v1242_v21 = vrot.slane %v1241_v10, 4  ;;  %v1246_v22 = vrot.slane %v1244_v11, 5  ;;  %v1260_v24 = vrot.slane %v1258_v13, 5  ;;  %vm1559_vm9 = vcmask 31744   ;;  %v1882_v27 = vld [vmem:[%s2056_s22 + $0x48] sm:$0xf] }
  0x5a   : > { %v1415_v19 = vsel %vm2162_vm7, %v1898_v16, %v1414_v5  ;;  %v1272_v55 = vshll.u32 %v2328_v50, 16  ;;  %v1899_v58 = vrot.slane %v1891_v20, 9  ;;  %v1422_v54 = vrot.slane %v2294_v7, 5  ;;  %v1947_v10 = vld [vmem:[%s2313_s14 + $0x8] sm:$0xff]  ;;  %v1944_v20 = vld [vmem:[%s2056_s22 + $0x34] sm:$0xf0] }
  0x5b   : > { %1837 = vmatmul.msk.bf16.gmra.mxu1 %vm473_vm2, %v1053_v1  ;;  %v1254_v1 = vrot.slane %v1252_v56, 5  ;;  %v1247_v25 = vsel %vm2084_vm4, %v1242_v21, %v1246_v22  ;;  %v1443_v42 = vunpack.c.l.b16 %v1415_v19  ;;  %v1291_v11 = vshrl.u32 %v1880_v2, 16 }
  0x5c   : > { %v1322_v17 = vunpack.c.l.b16 %v1247_v25  ;;  %v1274_v63 = vrot.slane %v1272_v55, 5  ;;  %v1305_v13 = vshrl.u32 %v1882_v27, 16  ;;  %v1893_v25 = vld [vmem:[%s2056_s22 + $0x30] sm:$0xe] }
  0x5d   : > { %v1255_v12 = vor.u32 %v1254_v1, %v1251_v0  ;;  %v1293_v21 = vrot.slane %v1291_v11, 4  ;;  %v1949_v11 = vld [vmem:[%s2313_s14 + $0x18] sm:$0xff] }
  0x5f   : > { %v1256_v23 = vrot.slane %v1255_v12, 4  ;;  %v1294_v12 = vshll.u32 %v1880_v2, 16  ;;  %v1903_v2 = vrot.slane %v1895_v43, 9 }
  0x60   : > { %1766 = vmatmul.msk.bf16.gmra.mxu2 %vm473_vm2, %v2211_v33  ;;  %v1214_v33 = vrot.slane %v1213_v40, 4  ;;  %v1942_v40 = vld [vmem:[%s2056_s22 + $0x14] sm:$0xf0] }
  0x61   : > { %v1261_v29 = vsel %vm2084_vm4, %v1256_v23, %v1260_v24  ;;  %v1851_v49 = vor.u32 %v1942_v40, %v1850_v38  ;;  %v1296_v22 = vrot.slane %v1294_v12, 5  ;;  %v1307_v23 = vrot.slane %v1305_v13, 4 }
  0x62   : > { %v1219_v60 = vsel %vm2084_vm4, %v1214_v33, %v1218_v51  ;;  %v1323_v44 = vunpack.c.l.b16 %v1261_v29  ;;  %v2331_v33 = vld [vmem:[%s2056_s22 + $0x3c] sm:$0x1]  ;;  %v1894_v29 = vld [vmem:[%s2056_s22 + $0x38] sm:$0xe]  ;;  %v1426_v38 = vrot.slane %v2328_v50, 5 }
  0x63   : > { %1816 = vmatmul.msk.bf16.gmra.mxu0 %vm473_vm2, %v931_v26  ;;  %1796 = vmatmul.msk.bf16.gmra.mxu3 %vm473_vm2, %v1792_v28  ;;  %v1320_v3 = vunpack.c.l.b16 %v1219_v60  ;;  %v1876_v26 = vld [vmem:[%s2056_s22 + $0x30] sm:$0xf]  ;;  %v1878_v28 = vld [vmem:[%s2056_s22 + $0x38] sm:$0xf]  ;;  %v1286_v57 = vshll.u32 %v2331_v33, 16  ;;  %v1900_v60 = vrot.slane %v1892_v52, 9 }
  0x64   : > { %v1263_v30 = vshrl.u32 %v1876_v26, 16  ;;  %v1266_v31 = vshll.u32 %v1876_v26, 16  ;;  %v1277_v34 = vshrl.u32 %v1878_v28, 16  ;;  %v1280_v35 = vshll.u32 %v1878_v28, 16  ;;  %v1881_v26 = vld [vmem:[%s2056_s22 + $0x44] sm:$0x1] }
  0x65   : > { %v1328_v15 = vpack.c.b16 %v1321_v4, %v1320_v3  ;;  %v1329_v18 = vpack.c.b16 %v1323_v44, %v1322_v17  ;;  %v1288_v1 = vrot.slane %v1286_v57, 5  ;;  %v1854_v3 = vld [vmem:[%s2056_s22 + $0x20] sm:$0xf]  ;;  %v1943_v4 = vld [vmem:[%s2056_s22 + $0x24] sm:$0xf0]  ;;  %v1902_v40 = vrot.slane %v1894_v29, 9 }
  0x66   : > { %v1265_v45 = vrot.slane %v1263_v30, 4  ;;  %v1268_v46 = vrot.slane %v1266_v31, 5  ;;  %v1279_v47 = vrot.slane %v1277_v34, 4  ;;  %v1282_v48 = vrot.slane %v1280_v35, 5  ;;  %v1883_v28 = vld [vmem:[%s2056_s22 + $0x4c] sm:$0x1] }
  0x67   : > { %v1297_v30 = vor.u32 %v1296_v22, %v1293_v21  ;;  %v1300_v31 = vshll.u32 %v1881_v26, 16  ;;  %v1314_v35 = vshll.u32 %v1883_v28, 16 }
  0x68   : > { %v1269_v53 = vor.u32 %v1268_v46, %v1265_v45  ;;  %v1283_v56 = vor.u32 %v1282_v48, %v1279_v47 }
  0x69   : > { %v1302_v17 = vrot.slane %v1300_v31, 5  ;;  %v1316_v45 = vrot.slane %v1314_v35, 5 }
  0x6a   : > { %v1270_v61 = vrot.slane %v1269_v53, 4  ;;  %v1284_v0 = vrot.slane %v1283_v56, 4 }
  0x6b   : > { %1838 = vmatmul.msk.bf16.gmra.mxu1 %vm473_vm2, %v1054_v59  ;;  %v1418_v59 = vrot.slane %v2291_v6, 5  ;;  %v1423_v6 = vsel %vm2162_vm7, %v1900_v60, %v1422_v54 }
  0x6c   : > { %v1275_v7 = vsel %vm2084_vm4, %v1270_v61, %v1274_v63  ;;  %v1289_v9 = vsel %vm2084_vm4, %v1284_v0, %v1288_v1  ;;  %v1896_v0 = vld [vmem:[%s2056_s22 + $0x48] sm:$0xe] }
  0x6d   : > { %v1419_v8 = vsel %vm2162_vm7, %v1899_v58, %v1418_v59  ;;  %v1324_v16 = vunpack.c.l.b16 %v1275_v7  ;;  %v1325_v5 = vunpack.c.l.b16 %v1289_v9 }
  0x6f   : > { %v1330_v19 = vpack.c.b16 %v1325_v5, %v1324_v16 }
  0x70   : > { %1767 = vmatmul.msk.bf16.gmra.mxu2 %vm473_vm2, %v2240_v36  ;;  %v1411_v36 = vsel %vm2162_vm7, %v1897_v62, %v1410_v32  ;;  %v1444_v62 = vunpack.c.l.b16 %v1419_v8  ;;  %v1445_v32 = vunpack.c.l.b16 %v1423_v6  ;;  %v1438_v8 = vrot.slane %v1883_v28, 5 }
  0x71   : > { %v1442_v41 = vunpack.c.l.b16 %v1411_v36 }
  0x72   : > { %v1451_v36 = vpack.c.b16 %v1445_v32, %v1444_v62 }
  0x73   : > { %1817 = vmatmul.msk.bf16.gmra.mxu0 %vm473_vm2, %v932_v14  ;;  %1885 = vmatmul.msk.bf16.vlgmr.msra.gmra.mxu3 %vm473_vm2, %v1328_v15  ;;  %v1450_v51 = vpack.c.b16 %v1443_v42, %v1442_v41  ;;  %v1308_v14 = vshll.u32 %v1882_v27, 16  ;;  %v1855_v15 = vor.u32 %v1943_v4, %v1854_v3  ;;  %v1430_v41 = vrot.slane %v2331_v33, 5 }
  0x74   : > { %v1298_v42 = vrot.slane %v1297_v30, 4  ;;  %v1434_v3 = vrot.slane %v1881_v26, 5  ;;  %v1904_v4 = vrot.slane %v1896_v0, 9 }
  0x75   : > { %v1310_v24 = vrot.slane %v1308_v14, 5  ;;  %v1431_v48 = vsel %vm2162_vm7, %v1902_v40, %v1430_v41  ;;  %v1862_v14 = vld [vmem:[%s2056_s22 + $0x40] sm:$0xf] }
  0x76   : > { %v1447_v53 = vunpack.c.l.b16 %v1431_v48  ;;  %v1435_v9 = vsel %vm2162_vm7, %v1903_v2, %v1434_v3 }
  0x77   : > { %v1311_v34 = vor.u32 %v1310_v24, %v1307_v23  ;;  %v1448_v32 = vunpack.c.l.b16 %v1435_v9 }
  0x79   : > { %v1312_v44 = vrot.slane %v1311_v34, 4 }
  0x7b   : > { %1926 = vmatmul.msk.bf16.vlgmr.msra.gmra.mxu1 %vm1559_vm9, %v1946_v37  ;;  %v1901_v37 = vrot.slane %v1893_v25, 9  ;;  %v1317_v50 = vsel %vm2084_vm4, %v1312_v44, %v1316_v45 }
  0x7c   : > { %v1327_v56 = vunpack.c.l.b16 %v1317_v50 }
  0x7d   : > { %v1427_v47 = vsel %vm2162_vm7, %v1901_v37, %v1426_v38 }
  0x7e   : > { %v1446_v52 = vunpack.c.l.b16 %v1427_v47 }
  0x80   : > { %1864 = vmatmul.msk.bf16.vlgmr.msra.gmra.mxu2 %vm473_vm2, %v1851_v49  ;;  %v1948_v49 = vld [vmem:[%s2313_s14 + $0x10] sm:$0xff]  ;;  %v1452_v59 = vpack.c.b16 %v1447_v53, %v1446_v52 }
  0x83   : > { %1906 = vmatmul.msk.bf16.vlgmr.msra.gmra.mxu0 %vm473_vm2, %v1450_v51  ;;  %1886 = vmatmul.msk.bf16.gmra.mxu3 %vm473_vm2, %v1329_v18  ;;  %v1303_v51 = vsel %vm2084_vm4, %v1298_v42, %v1302_v17  ;;  %v1858_v18 = vld [vmem:[%s2056_s22 + $0x30] sm:$0xf] }
  0x84   : > { %v1326_v55 = vunpack.c.l.b16 %v1303_v51  ;;  %v1859_v57 = vor.u32 %v1944_v20, %v1858_v18 }
  0x86   : > { %v1331_v60 = vpack.c.b16 %v1327_v56, %v1326_v55 }
  0x8b   : > { %1927 = vmatmul.msk.bf16.gmra.mxu1 %vm1559_vm9, %v1947_v10  ;;  %v1439_v10 = vsel %vm2162_vm7, %v1904_v4, %v1438_v8 }
  0x8c   : > { %v1449_v16 = vunpack.c.l.b16 %v1439_v10 }
  0x8e   : > { %v1453_v23 = vpack.c.b16 %v1449_v16, %v1448_v32 }
  0x90   : > { %1865 = vmatmul.msk.bf16.gmra.mxu2 %vm473_vm2, %v1855_v15  ;;  %v1945_v15 = vld [vmem:[%s2056_s22 + $0x44] sm:$0xf0] }
  0x91   : > { %v1863_v21 = vor.u32 %v1945_v15, %v1862_v14 }
  0x93   : > { %1907 = vmatmul.msk.bf16.gmra.mxu0 %vm473_vm2, %v1451_v36  ;;  %1887 = vmatmul.msk.bf16.gmra.mxu3 %vm473_vm2, %v1330_v19 }
  0x96   : > { %v573_v46 = vpop.f32.mrf.mxu3 }
  0x98   : > { %v563_v33 = vpop.f32.mrf.mxu1 }
  0x9b   : > { %1928 = vmatmul.msk.bf16.gmra.mxu1 %vm1559_vm9, %v1948_v49 }
  0x9e   : > { %v575_v58 = vpop.f32.mrf.mxu3 }
  0xa0   : > { %v499_v54 = vpop.f32.mrf.mxu0  ;;  %1866 = vmatmul.msk.bf16.gmra.mxu2 %vm473_vm2, %v1859_v57  ;;  %v565_v63 = vpop.f32.mrf.mxu1 }
  0xa1   : > { %v2379_v61 = vadd.f32 %v563_v33, %v499_v54 }
  0xa3   : > { %1908 = vmatmul.msk.bf16.gmra.mxu0 %vm473_vm2, %v1452_v59  ;;  %v509_v1 = vpop.f32.mrf.mxu2  ;;  %1888 = vmatmul.msk.bf16.gmra.mxu3 %vm473_vm2, %v1331_v60 }
  0xa4   : > { %v2384_v27 = vadd.f32 %v573_v46, %v509_v1 }
  0xa6   : > { %v578_v6 = vpop.f32.mrf.mxu3 }
  0xa8   : > { %v501_v7 = vpop.f32.mrf.mxu0  ;;  %v568_v13 = vpop.f32.mrf.mxu1 }
  0xa9   : > { %v566_v12 = vadd.f32 %v565_v63, %v501_v7 }
  0xab   : > { %v511_v62 = vpop.f32.mrf.mxu2  ;;  %1929 = vmatmul.msk.bf16.gmra.mxu1 %vm1559_vm9, %v1949_v11 }
  0xac   : > { %v2393_v5 = vadd.f32 %v575_v58, %v511_v62 }
  0xae   : > { %v580_v22 = vpop.f32.mrf.mxu3 }
  0xb0   : > { %v504_v24 = vpop.f32.mrf.mxu0  ;;  %1867 = vmatmul.msk.bf16.gmra.mxu2 %vm473_vm2, %v1863_v21  ;;  %v570_v26 = vpop.f32.mrf.mxu1 }
  0xb1   : > { %v569_v39 = vadd.f32 %v568_v13, %v504_v24 }
  0xb3   : > { %1909 = vmatmul.msk.bf16.gmra.mxu0 %vm473_vm2, %v1453_v23  ;;  %v514_v28 = vpop.f32.mrf.mxu2 }
  0xb4   : > { %v2398_v36 = vadd.f32 %v578_v6, %v514_v28 }
  0xb6   : > { %v763_v19 = vpop.f32.mrf.mxu3 }
  0xb8   : > { %v506_v25 = vpop.f32.mrf.mxu0  ;;  %v1079_v30 = vpop.f32.mrf.mxu1 }
  0xb9   : > { %v2400_v29 = vadd.f32 %v570_v26, %v506_v25 }
  0xbb   : > { %v516_v31 = vpop.f32.mrf.mxu2 }
  0xbc   : > { %v2402_v34 = vadd.f32 %v580_v22, %v516_v31  ;;  %v2454_v22 = vld [vmem:[%s2544_s3] ss:$0 sm:$0xff] }
  0xbd   : > { %v2462_v31 = vld [vmem:[%s2548_s7] ss:$0 sm:$0xff] }
  0xbe   : > { %v765_v35 = vpop.f32.mrf.mxu3 }
  0xc0   : > { %v957_v37 = vpop.f32.mrf.mxu0  ;;  %v1081_v38 = vpop.f32.mrf.mxu1 }
  0xc3   : > { %v680_v40 = vpop.f32.mrf.mxu2 }
  0xc4   : > { %v700_v63 = vadd.f32 %v680_v40, %v2379_v61  ;;  %v2444_v61 = vld [vmem:[%s2543_s2] ss:$0 sm:$0xff] }
  0xc6   : > { %v768_v41 = vpop.f32.mrf.mxu3  ;;  %v783_v2 = vadd.f32 %v763_v19, %v700_v63 }
  0xc8   : > { %v959_v42 = vpop.f32.mrf.mxu0  ;;  %v2404_v17 = vpop.f32.mrf.mxu1  ;;  %v977_v8 = vadd.f32 %v957_v37, %v783_v2 }
  0xca   : > { %v1099_v10 = vadd.f32 %v1079_v30, %v977_v8 }
  0xcb   : > { %v682_v44 = vpop.f32.mrf.mxu2 }
  0xcc   : > { %v701_v6 = vadd.f32 %v682_v44, %v566_v12  ;;  %v2449_v12 = vld [vmem:[%s2547_s6] ss:$0 sm:$0xff] }
  0xce   : > { %v770_v45 = vpop.f32.mrf.mxu3  ;;  %v784_v11 = vadd.f32 %v765_v35, %v701_v6 }
  0xd0   : > { %v962_v46 = vpop.f32.mrf.mxu0  ;;  %v2406_v47 = vpop.f32.mrf.mxu1  ;;  %v978_v62 = vadd.f32 %v959_v42, %v784_v11 }
  0xd2   : > { %v1100_v24 = vadd.f32 %v1081_v38, %v978_v62 }
  0xd3   : > { %v685_v48 = vpop.f32.mrf.mxu2 }
  0xd4   : > { %v702_v32 = vadd.f32 %v685_v48, %v569_v39 }
  0xd6   : > { %v2408_v49 = vpop.f32.mrf.mxu3  ;;  %v785_v39 = vadd.f32 %v768_v41, %v702_v32 }
  0xd8   : > { %v2410_v51 = vpop.f32.mrf.mxu0  ;;  %v2412_v50 = vpop.f32.mrf.mxu1  ;;  %v979_v40 = vadd.f32 %v962_v46, %v785_v39 }
  0xda   : > { %v1101_v2 = vadd.f32 %v2404_v17, %v979_v40 }
  0xdb   : > { %v687_v33 = vpop.f32.mrf.mxu2 }
  0xdc   : > { %v703_v37 = vadd.f32 %v687_v33, %v2400_v29 }
  0xde   : > { %v2414_v18 = vpop.f32.mrf.mxu3 }
  0xe0   : > { %v2416_v20 = vpop.f32.mrf.mxu0  ;;  %v2418_v52 = vpop.f32.mrf.mxu1 }
  0xe3   : > { %v690_v53 = vpop.f32.mrf.mxu2 }
  0xe6   : > { %v2420_v55 = vpop.f32.mrf.mxu3 }
  0xe8   : > { %v2422_v56 = vpop.f32.mrf.mxu0  ;;  %v2424_v57 = vpop.f32.mrf.mxu1 }
  0xeb   : > { %v2426_v58 = vpop.f32.mrf.mxu2 }
  0xee   : > { %v2428_v59 = vpop.f32.mrf.mxu3 }
  0xf0   : > { %v2430_v60 = vpop.f32.mrf.mxu0  ;;  %v2432_v54 = vpop.f32.mrf.mxu1 }
  0xf3   : > { %v2434_v43 = vpop.f32.mrf.mxu2 }
  0xf6   : > { %v1356_v0 = vpop.f32.mrf.mxu3 }
  0xf8   : > { %v2437_v1 = vpop.f32.mrf.mxu0  ;;  %v1585_v4 = vpop.f32.mrf.mxu1 }
  0xf9   : > { %v1609_v28 = vmul.f32 %v2449_v12, %v1585_v4 }
  0xfb   : > { %v2439_v3 = vpop.f32.mrf.mxu2 }
  0xfe   : > { %v1358_v9 = vpop.f32.mrf.mxu3 }
 0x100   : > { %v1478_v7 = vpop.f32.mrf.mxu0  ;;  %v1587_v15 = vpop.f32.mrf.mxu1 }
 0x101   : > { %v1610_v8 = vmul.f32 %v2449_v12, %v1587_v15 }
 0x103   : > { %v1162_v13 = vpop.f32.mrf.mxu2 }
 0x104   : > { %v1182_v14 = vadd.f32 %v1162_v13, %v1099_v10 }
 0x106   : > { %v1376_v16 = vadd.f32 %v1356_v0, %v1182_v14  ;;  %v1361_v25 = vpop.f32.mrf.mxu3  ;;  %v786_v0 = vadd.f32 %v770_v45, %v703_v37 }
 0x108   : > { %v1498_v21 = vadd.f32 %v1478_v7, %v1376_v16  ;;  %v1480_v23 = vpop.f32.mrf.mxu0  ;;  %v1590_v42 = vpop.f32.mrf.mxu1  ;;  %v980_v45 = vadd.f32 %v2410_v51, %v786_v0 }
 0x10a   : > { %v1510_v26 = vmul.f32 %v2444_v61, %v1498_v21  ;;  %v1102_v62 = vadd.f32 %v2406_v47, %v980_v45 }
 0x10b   : > { %v1164_v19 = vpop.f32.mrf.mxu2 }
 0x10c   : > { %v1522_v30 = vadd.f32 %v2454_v22, %v1510_v26  ;;  %v1183_v35 = vadd.f32 %v1164_v19, %v1100_v24  ;;  %v705_v24 = vadd.f32 %v2426_v58, %v2393_v5 }
 0x10e   : > { %v1617_v38 = vadd.f32 %v1609_v28, %v1522_v30  ;;  %v1377_v41 = vadd.f32 %v1358_v9, %v1183_v35  ;;  %v1363_v7 = vpop.f32.mrf.mxu3  ;;  %v704_v9 = vadd.f32 %v690_v53, %v2384_v27 }
 0x110   : > { %v1629_v44 = vadd.f32 %v2462_v31, %v1617_v38  ;;  %v1499_v48 = vadd.f32 %v1480_v23, %v1377_v41  ;;  %v1483_v63 = vpop.f32.mrf.mxu0  ;;  %v1592_v32 = vpop.f32.mrf.mxu1  ;;  %v787_v16 = vadd.f32 %v2408_v49, %v704_v9  ;;  %v1611_v23 = vmul.f32 %v2449_v12, %v1590_v42 }
 0x112   : > { %v1637_v4 = vmax.f32 %v1629_v44, 0.0  ;;  %v1511_v29 = vmul.f32 %v2444_v61, %v1499_v48  ;;  %v981_v47 = vadd.f32 %v2416_v20, %v787_v16  ;;  %v1612_v20 = vmul.f32 %v2449_v12, %v1592_v32 }
 0x113   : > { %v1167_v46 = vpop.f32.mrf.mxu2 }
 0x114   : > { %1645 = vst.msk [vmem:[%s2470_s26] sm:$0xff] %vm473_vm2, %v1637_v4  ;;  %v1523_v33 = vadd.f32 %v2454_v22, %v1511_v29  ;;  %v1184_v6 = vadd.f32 %v1167_v46, %v1101_v2  ;;  %v1103_v35 = vadd.f32 %v2412_v50, %v981_v47 }
 0x116   : > { %v1618_v10 = vadd.f32 %v1610_v8, %v1523_v33  ;;  %v1378_v11 = vadd.f32 %v1361_v25, %v1184_v6  ;;  %v1366_v49 = vpop.f32.mrf.mxu3  ;;  %v788_v25 = vadd.f32 %v2414_v18, %v705_v24  ;;  %v706_v18 = vadd.f32 %v2434_v43, %v2398_v36 }
 0x118   : > { %v1630_v17 = vadd.f32 %v2462_v31, %v1618_v10  ;;  %v1500_v13 = vadd.f32 %v1483_v63, %v1378_v11  ;;  %v1485_v14 = vpop.f32.mrf.mxu0  ;;  %v1595_v41 = vpop.f32.mrf.mxu1  ;;  %v982_v42 = vadd.f32 %v2422_v56, %v788_v25  ;;  %v789_v4 = vadd.f32 %v2420_v55, %v706_v18 }
 0x119   : > { %v1613_v33 = vmul.f32 %v2449_v12, %v1595_v41 }
 0x11a   : > { %v1638_v21 = vmax.f32 %v1630_v17, 0.0  ;;  %v1512_v15 = vmul.f32 %v2444_v61, %v1500_v13  ;;  %v1104_v0 = vadd.f32 %v2418_v52, %v982_v42  ;;  %v983_v45 = vadd.f32 %v2430_v60, %v789_v4 }
 0x11b   : > { %v1169_v51 = vpop.f32.mrf.mxu2  ;;  %v707_v52 = vadd.f32 %v2439_v3, %v2402_v34 }
 0x11c   : > { %1646 = vst.msk [vmem:[%s2470_s26 + $0x8] sm:$0xff] %vm473_vm2, %v1638_v21  ;;  %v1524_v27 = vadd.f32 %v2454_v22, %v1512_v15  ;;  %v1185_v53 = vadd.f32 %v1169_v51, %v1102_v62  ;;  %v1105_v11 = vadd.f32 %v2424_v57, %v983_v45 }
 0x11d   : > { %v790_v17 = vadd.f32 %v2428_v59, %v707_v52 }
 0x11e   : > { %v1619_v39 = vadd.f32 %v1611_v23, %v1524_v27  ;;  %v1379_v26 = vadd.f32 %v1363_v7, %v1185_v53  ;;  %v1368_v2 = vpop.f32.mrf.mxu3 }
 0x11f   : > { %v984_v21 = vadd.f32 %v2437_v1, %v790_v17 }
 0x120   : > { %v1631_v28 = vadd.f32 %v2462_v31, %v1619_v39  ;;  %v1501_v19 = vadd.f32 %v1485_v14, %v1379_v26  ;;  %v1488_v30 = vpop.f32.mrf.mxu0  ;;  %v1597_v6 = vpop.f32.mrf.mxu1 }
 0x121   : > { %v1614_v34 = vmul.f32 %v2449_v12, %v1597_v6  ;;  %v1106_v27 = vadd.f32 %v2432_v54, %v984_v21 }
 0x122   : > { %v1639_v37 = vmax.f32 %v1631_v28, 0.0  ;;  %v1513_v40 = vmul.f32 %v2444_v61, %v1501_v19 }
 0x123   : > { %v1172_v38 = vpop.f32.mrf.mxu2 }
 0x124   : > { %1647 = vst.msk [vmem:[%s2470_s26 + $0x10] sm:$0xff] %vm473_vm2, %v1639_v37  ;;  %v1525_v5 = vadd.f32 %v2454_v22, %v1513_v40  ;;  %v1186_v58 = vadd.f32 %v1172_v38, %v1103_v35 }
 0x126   : > { %v1620_v44 = vadd.f32 %v1612_v20, %v1525_v5  ;;  %v1380_v50 = vadd.f32 %v1366_v49, %v1186_v58  ;;  %v1371_v62 = vpop.f32.mrf.mxu3 }
 0x128   : > { %v1632_v48 = vadd.f32 %v2462_v31, %v1620_v44  ;;  %v1502_v63 = vadd.f32 %v1488_v30, %v1380_v50  ;;  %v1490_v8 = vpop.f32.mrf.mxu0  ;;  %v1600_v23 = vpop.f32.mrf.mxu1 }
 0x129   : > { %v1615_v47 = vmul.f32 %v2449_v12, %v1600_v23 }
 0x12a   : > { %v1640_v29 = vmax.f32 %v1632_v48, 0.0  ;;  %v1514_v46 = vmul.f32 %v2444_v61, %v1502_v63 }
 0x12b   : > { %v1174_v56 = vpop.f32.mrf.mxu2 }
 0x12c   : > { %1648 = vst.msk [vmem:[%s2470_s26 + $0x18] sm:$0xff] %vm473_vm2, %v1640_v29  ;;  %v1526_v36 = vadd.f32 %v2454_v22, %v1514_v46  ;;  %v1187_v43 = vadd.f32 %v1174_v56, %v1104_v0 }
 0x12e   : > { %v1621_v55 = vadd.f32 %v1613_v33, %v1526_v36  ;;  %v1381_v7 = vadd.f32 %v1368_v2, %v1187_v43  ;;  %v1373_v49 = vpop.f32.mrf.mxu3 }
 0x130   : > { %v1633_v9 = vadd.f32 %v2462_v31, %v1621_v55  ;;  %v1503_v10 = vadd.f32 %v1490_v8, %v1381_v7  ;;  %v1493_v16 = vpop.f32.mrf.mxu0  ;;  %v1602_v35 = vpop.f32.mrf.mxu1 }
 0x131   : > { %v1616_v41 = vmul.f32 %v2449_v12, %v1602_v35 }
 0x132   : > { %v1641_v13 = vmax.f32 %v1633_v9, 0.0  ;;  %v1515_v14 = vmul.f32 %v2444_v61, %v1503_v10 }
 0x133   : > { %v1177_v32 = vpop.f32.mrf.mxu2 }
 0x134   : > { %1649 = vst.msk [vmem:[%s2470_s26 + $0x20] sm:$0xff] %vm473_vm2, %v1641_v13  ;;  %v1527_v60 = vadd.f32 %v2454_v22, %v1515_v14  ;;  %v1188_v3 = vadd.f32 %v1177_v32, %v1105_v11 }
 0x136   : > { %v1622_v15 = vadd.f32 %v1614_v34, %v1527_v60  ;;  %v1382_v57 = vadd.f32 %v1371_v62, %v1188_v3 }
 0x138   : > { %v1634_v59 = vadd.f32 %v2462_v31, %v1622_v15  ;;  %v1504_v51 = vadd.f32 %v1493_v16, %v1382_v57  ;;  %v1495_v25 = vpop.f32.mrf.mxu0 }
 0x13a   : > { %v1642_v53 = vmax.f32 %v1634_v59, 0.0  ;;  %v1516_v24 = vmul.f32 %v2444_v61, %v1504_v51 }
 0x13b   : > { %v1179_v39 = vpop.f32.mrf.mxu2 }
 0x13c   : > { %1650 = vst.msk [vmem:[%s2470_s26 + $0x28] sm:$0xff] %vm473_vm2, %v1642_v53  ;;  %v1528_v26 = vadd.f32 %v2454_v22, %v1516_v24  ;;  %v1189_v1 = vadd.f32 %v1179_v39, %v1106_v27 }
 0x13e   : > { %v1623_v28 = vadd.f32 %v1615_v47, %v1528_v26  ;;  %v1383_v19 = vadd.f32 %v1373_v49, %v1189_v1 }
 0x140   : > { %v1635_v30 = vadd.f32 %v2462_v31, %v1623_v28  ;;  %v1505_v54 = vadd.f32 %v1495_v25, %v1383_v19 }
 0x142   : > { %v1643_v37 = vmax.f32 %v1635_v30, 0.0  ;;  %v1517_v40 = vmul.f32 %v2444_v61, %v1505_v54 }
 0x144   : > { %1651 = vst.msk [vmem:[%s2470_s26 + $0x30] sm:$0xff] %vm473_vm2, %v1643_v37  ;;  %v1529_v38 = vadd.f32 %v2454_v22, %v1517_v40 }
 0x146   : > { %v1624_v5 = vadd.f32 %v1616_v41, %v1529_v38 }
 0x148   : > { %v1636_v20 = vadd.f32 %v2462_v31, %v1624_v5 }
 0x14a   : > { %v1644_v58 = vmax.f32 %v1636_v20, 0.0 }
 0x14c   : > { %1652 = vst.msk [vmem:[%s2470_s26 + $0x38] sm:$0xff] %vm473_vm2, %v1644_v58 }
 0x14d PF: > { %s18_s27 = sadd.s32 1, %s1971_s27  }
 0x14e   : > { %p15_p4 = scmp.ge.s32.totalorder %s18_s27, 4  }
 0x150   :  { %17 = sbr.rel (!%p15_p4) target bundleno = 1 (0x1), region = 95 }

</bundles_post_ra>
